<compile_context>
chip_gen: v7x
topology: tpu7x:2x2x1
jax: 0.10.0
libtpu: 0.0.40
codegen_flags: <defaults>
</compile_context>

<pallas_src>
import jax
import jax.numpy as jnp
from jax.experimental import pallas as pl
from jax.experimental.pallas import tpu as pltpu

D_IN = 1280      # fc1 input dim
H = 256          # fc1 output dim
OUT_PAD = 128    # lane-padded fc2 output width (true output width = 1)
B_TILE = 8       # batch rows per grid step (full f32 sublane tile)


def _cdiv(a, b):
    return (a + b - 1) // b


def _round_up(x, m):
    return _cdiv(x, m) * m


def _pick_tiling():
    """Per-generation L-tile cap and VMEM limit (conservative if unknown)."""
    try:
        cap = getattr(pltpu.get_tpu_info(), "vmem_capacity_bytes", None)
    except Exception:
        cap = None
    if cap is not None and cap >= 100 * 1024 * 1024:
        return 512, 96 * 1024 * 1024      # v5e / v6e: 128 MiB physical VMEM
    return 256, 48 * 1024 * 1024          # v7x-class (64 MiB per TC) / unknown


L_TILE_MAX, VMEM_LIMIT_BYTES = _pick_tiling()


def _make_kernel(b_tile, l_tile, h_dim, d_in, l_actual, l_pad,
                 rows_per_split, n_splits):
    """Kernel closure over static tiling parameters."""
    needs_correction = l_pad != l_actual

    def kernel(delta_ref, w1_ref, b1_ref, w2_ref, b2_ref, out_ref, acc_ref):
        # delta_ref : (b_tile, l_tile, d_in) bf16   (the ONLY streamed tensor)
        # w1_ref    : (d_in, h_dim)          bf16   (resident)
        # b1_ref    : (1, h_dim)             f32
        # w2_ref    : (h_dim, OUT_PAD)       f32    (lane-padded fc2 weight)
        # b2_ref    : (1, OUT_PAD)           f32    (lane-padded fc2 bias)
        # out_ref   : (1, b_tile, OUT_PAD)   f32    (per-split partial output)
        # acc_ref   : (b_tile, h_dim)        f32    scratch accumulator
        l_step = pl.program_id(2)

        @pl.when(l_step == 0)
        def _():
            acc_ref[...] = jnp.zeros_like(acc_ref)

        # fc1 + ReLU: bf16 x bf16 with f32 accumulation on the MXU.
        x = delta_ref[...].reshape(b_tile * l_tile, d_in)
        h = jnp.dot(x, w1_ref[...], preferred_element_type=jnp.float32)
        h = jnp.maximum(h + b1_ref[...], 0.0)
        acc_ref[...] += jnp.sum(h.reshape(b_tile, l_tile, h_dim), axis=1)

        @pl.when(l_step == pl.num_programs(2) - 1)
        def _():
            acc = acc_ref[...]
            if needs_correction:
                # Zero-padded sequence rows contribute exactly relu(b1) each;
                # subtract them analytically (no per-step iota mask).
                relu_b1 = jnp.maximum(b1_ref[...], 0.0)
                if n_splits == 1:
                    acc = acc - float(l_pad - l_actual) * relu_b1
                else:
                    split = pl.program_id(1)
                    split_start = split * rows_per_split
                    pad_rows = jnp.maximum(
                        split_start + rows_per_split
                        - jnp.maximum(split_start, l_actual), 0)
                    acc = acc - pad_rows.astype(jnp.float32) * relu_b1
            res = jnp.dot(acc, w2_ref[...], preferred_element_type=jnp.float32)
            if n_splits == 1:
                res = res + b2_ref[...]
            else:
                # fc2 is linear: per-split partials are summed in the wrapper,
                # so add the bias only once (split 0).
                res = res + jnp.where(pl.program_id(1) == 0,
                                      b2_ref[...], jnp.zeros_like(b2_ref[...]))
            out_ref[0] = res

    return kernel


def prepare_params(w1, b1, w2, b2):
    """Build kernel-ready parameters once (hoisted out of the per-call path).

    w1: [D_IN, H] ([in, out], transposed from PyTorch's [out, in])
    b1: [H];  w2: [H, 1] ([in, out]);  b2: [1]
    """
    w1_bf16 = w1.astype(jnp.bfloat16)
    b1_2d = b1.reshape(1, H).astype(jnp.float32)
    w2_pad = jnp.zeros((H, OUT_PAD), jnp.float32).at[:, 0].set(
        w2[:, 0].astype(jnp.float32))
    b2_pad = jnp.zeros((1, OUT_PAD), jnp.float32).at[0, 0].set(
        b2[0].astype(jnp.float32))
    return w1_bf16, b1_2d, w2_pad, b2_pad


@jax.jit
def protein_model_forward(embedding, wt_embedding, params):
    """embedding, wt_embedding: [B, L, D_IN]; returns [B, 1] predicted DMS score."""
    w1_bf16, b1_2d, w2_pad, b2_pad = params
    B, L, D = embedding.shape
    assert D == D_IN

    # Single streamed tensor: subtract in f32 (before rounding!), then cast to
    # bf16.  The pad below folds into the same fused producer.
    delta = (embedding.astype(jnp.float32)
             - wt_embedding.astype(jnp.float32)).astype(jnp.bfloat16)

    # L tile chosen to minimise padding waste on this HBM-bound kernel.
    n_chunks = _cdiv(L, L_TILE_MAX)
    l_tile = min(_round_up(_cdiv(L, n_chunks), 16), L_TILE_MAX)

    B_pad = _round_up(B, B_TILE)
    n_b_blocks = B_pad // B_TILE
    n_l_tiles = _cdiv(L, l_tile)

    # Single batch block + multiple L tiles: split the reduction into two
    # "parallel" halves so both TensorCores of a v7x-class chip get work
    # (no-op on 1-TC chips).  Partials are combined in the wrapper.
    n_splits = 2 if (n_b_blocks == 1 and n_l_tiles >= 2) else 1
    n_l_tiles = _round_up(n_l_tiles, n_splits)
    l_tiles_per_split = n_l_tiles // n_splits
    L_pad = n_l_tiles * l_tile

    if (B_pad, L_pad) != (B, L):
        delta = jnp.pad(delta, ((0, B_pad - B), (0, L_pad - L), (0, 0)))

    grid = (n_b_blocks, n_splits, l_tiles_per_split)
    kernel = _make_kernel(B_TILE, l_tile, H, D_IN, L, L_pad,
                          l_tile * l_tiles_per_split, n_splits)

    cost = pl.CostEstimate(
        flops=2 * B_pad * L_pad * D_IN * H + 2 * n_splits * B_pad * H * OUT_PAD,
        transcendentals=0,
        bytes_accessed=(B_pad * L_pad * D_IN * 2          # bf16 delta stream
                        + D_IN * H * 2                    # bf16 W1
                        + H * 4 + H * OUT_PAD * 4 + OUT_PAD * 4
                        + n_splits * B_pad * OUT_PAD * 4),
    )

    partials = pl.pallas_call(
        kernel,
        out_shape=jax.ShapeDtypeStruct((n_splits, B_pad, OUT_PAD), jnp.float32),
        grid_spec=pltpu.PrefetchScalarGridSpec(
            num_scalar_prefetch=0,
            grid=grid,
            in_specs=[
                pl.BlockSpec((B_TILE, l_tile, D_IN),
                             lambda b, s, l: (b, s * l_tiles_per_split + l, 0)),
                pl.BlockSpec((D_IN, H), lambda b, s, l: (0, 0)),      # W1 (resident)
                pl.BlockSpec((1, H), lambda b, s, l: (0, 0)),         # b1
                pl.BlockSpec((H, OUT_PAD), lambda b, s, l: (0, 0)),   # W2 (padded)
                pl.BlockSpec((1, OUT_PAD), lambda b, s, l: (0, 0)),   # b2 (padded)
            ],
            out_specs=pl.BlockSpec((1, B_TILE, OUT_PAD),
                                   lambda b, s, l: (s, b, 0)),
            scratch_shapes=[pltpu.VMEM((B_TILE, H), jnp.float32)],
        ),
        compiler_params=pltpu.CompilerParams(
            dimension_semantics=("parallel", "parallel", "arbitrary"),
            vmem_limit_bytes=VMEM_LIMIT_BYTES,
        ),
        cost_estimate=cost,
    )(delta, w1_bf16, b1_2d, w2_pad, b2_pad)

    res = partials.sum(axis=0) if n_splits > 1 else partials[0]
    return res[:B, :1]   # [B, 1]


# TODO(synk): the PyTorch module's data-dict plumbing and cuda/mps/cpu
# `.to(device)` dispatch are host-side concerns with no kernel equivalent;
# only the math is implemented.


if __name__ == "__main__":
    key = jax.random.PRNGKey(0)
    k_emb, k_wt, k_w1, k_b1, k_w2, k_b2 = jax.random.split(key, 6)

    B, L = 2, 8   # batch=2, sequence length=8

    embedding = jax.random.normal(k_emb, (B, L, D_IN), jnp.float32)
    wt_embedding = jax.random.normal(k_wt, (B, L, D_IN), jnp.float32)

    # Deterministic parameter init (uniform, PyTorch-Linear-like scale).
    bound1 = 1.0 / (D_IN ** 0.5)
    w1 = jax.random.uniform(k_w1, (D_IN, H), jnp.float32, -bound1, bound1)   # [in, out]
    b1 = jax.random.uniform(k_b1, (H,), jnp.float32, -bound1, bound1)
    bound2 = 1.0 / (H ** 0.5)
    w2 = jax.random.uniform(k_w2, (H, 1), jnp.float32, -bound2, bound2)      # [in, out]
    b2 = jax.random.uniform(k_b2, (1,), jnp.float32, -bound2, bound2)

    params = prepare_params(w1, b1, w2, b2)
    out = protein_model_forward(embedding, wt_embedding, params)
    out = jax.block_until_ready(out)
    assert out.shape == (B, 1), out.shape

    # Reference 1: identical numerics to the kernel (f32 diff -> bf16, bf16 fc1
    # operands, f32 accumulation) -- tight check.
    delta_bf = (embedding - wt_embedding).astype(jnp.bfloat16)
    h_ref = jnp.matmul(delta_bf, w1.astype(jnp.bfloat16),
                       preferred_element_type=jnp.float32)
    h_ref = jnp.maximum(h_ref + b1, 0.0)
    ref_bf = jnp.sum(h_ref, axis=1) @ w2 + b2
    assert jnp.allclose(out, ref_bf, rtol=2e-3, atol=2e-3), (out, ref_bf)

    # Reference 2: full-f32 PyTorch semantics.  Tighter than before because the
    # difference is now computed in f32 before bf16 rounding.
    x32 = embedding - wt_embedding
    ref32 = jnp.sum(jnp.maximum(x32 @ w1 + b1, 0.0), axis=1) @ w2 + b2
    assert jnp.allclose(out, ref32, rtol=5e-2, atol=5e-2), (out, ref32)

    print("KERNEL_OK")
</pallas_src>

<mosaic_0001>
module attributes {stable_mosaic.version = 11 : i64} {
  func.func @kernel(%arg0: i32, %arg1: i32, %arg2: i32, %arg3: memref<8x16x1280xbf16, #tpu.memory_space<vmem>>, %arg4: memref<1280x256xbf16, #tpu.memory_space<vmem>>, %arg5: memref<1x256xf32, #tpu.memory_space<vmem>>, %arg6: memref<256x128xf32, #tpu.memory_space<vmem>>, %arg7: memref<1x128xf32, #tpu.memory_space<vmem>>, %arg8: memref<1x8x128xf32, #tpu.memory_space<vmem>>, %arg9: memref<8x256xf32, #tpu.memory_space<vmem>>) attributes {dimension_semantics = [#tpu.dimension_semantics<parallel>, #tpu.dimension_semantics<parallel>, #tpu.dimension_semantics<arbitrary>], iteration_bounds = array<i64: 1, 1, 1>, scalar_prefetch = 0 : i64, scratch_operands = 1 : i64, tpu.core_type = #tpu.core_type<tc>, window_params = [{transform_indices = @transform_0, window_bounds = array<i64: 8, 16, 1280>}, {pipeline_mode = #tpu.pipeline_mode<synchronous>, transform_indices = @transform_1, window_bounds = array<i64: 1280, 256>}, {pipeline_mode = #tpu.pipeline_mode<synchronous>, transform_indices = @transform_2, window_bounds = array<i64: 1, 256>}, {pipeline_mode = #tpu.pipeline_mode<synchronous>, transform_indices = @transform_3, window_bounds = array<i64: 256, 128>}, {pipeline_mode = #tpu.pipeline_mode<synchronous>, transform_indices = @transform_4, window_bounds = array<i64: 1, 128>}, {transform_indices = @transform_5, window_bounds = array<i64: 1, 8, 128>}]} {
    %c0_i32 = arith.constant 0 : i32
    %0 = arith.cmpi eq, %arg2, %c0_i32 : i32
    %1 = arith.extui %0 : i1 to i32
    %c0_i32_0 = arith.constant 0 : i32
    %2 = arith.cmpi ne, %1, %c0_i32_0 : i32
    scf.if %2 {
      %cst_15 = arith.constant 0.000000e+00 : f32
      %20 = vector.broadcast %cst_15 : f32 to vector<8x256xf32>
      %c0_16 = arith.constant 0 : index
      %c0_17 = arith.constant 0 : index
      %21 = vector.load %arg9[%c0_16, %c0_17] : memref<8x256xf32, #tpu.memory_space<vmem>>, vector<8x256xf32>
      tpu.vector_store %arg9[%c0_16, %c0_17], %20 {strides = array<i32>} : memref<8x256xf32, #tpu.memory_space<vmem>>, vector<8x256xf32>,
    } else {
    }
    %c0 = arith.constant 0 : index
    %c0_1 = arith.constant 0 : index
    %c0_2 = arith.constant 0 : index
    %3 = vector.load %arg3[%c0, %c0_1, %c0_2] : memref<8x16x1280xbf16, #tpu.memory_space<vmem>>, vector<8x16x1280xbf16>
    %4 = vector.shape_cast %3 : vector<8x16x1280xbf16> to vector<128x1280xbf16>
    %c0_3 = arith.constant 0 : index
    %c0_4 = arith.constant 0 : index
    %5 = vector.load %arg4[%c0_3, %c0_4] : memref<1280x256xbf16, #tpu.memory_space<vmem>>, vector<1280x256xbf16>
    %cst = arith.constant dense<0.000000e+00> : vector<128x256xf32>
    %6 = tpu.matmul %4, %5, %cst {dimension_numbers = #tpu.dot_dimension_numbers<[1], [0], [0], [1], [0, 0, 1, 1], [], []>} : vector<128x1280xbf16>, vector<1280x256xbf16>, vector<128x256xf32> -> vector<128x256xf32>
    %c0_5 = arith.constant 0 : index
    %c0_6 = arith.constant 0 : index
    %7 = vector.load %arg5[%c0_5, %c0_6] : memref<1x256xf32, #tpu.memory_space<vmem>>, vector<1x256xf32>
    %8 = vector.broadcast %7 : vector<1x256xf32> to vector<128x256xf32>
    %9 = arith.addf %6, %8 : vector<128x256xf32>
    %cst_7 = arith.constant 0.000000e+00 : f32
    %10 = vector.broadcast %cst_7 : f32 to vector<128x256xf32>
    %11 = arith.maximumf %9, %10 : vector<128x256xf32>
    %c0_8 = arith.constant 0 : index
    %c0_9 = arith.constant 0 : index
    %12 = vector.load %arg9[%c0_8, %c0_9] : memref<8x256xf32, #tpu.memory_space<vmem>>, vector<8x256xf32>
    %13 = vector.shape_cast %11 : vector<128x256xf32> to vector<8x16x256xf32>
    %cst_10 = arith.constant dense<0.000000e+00> : vector<8x256xf32>
    %14 = vector.multi_reduction <add>, %13, %cst_10 [1] : vector<8x16x256xf32> to vector<8x256xf32>
    %15 = arith.addf %12, %14 : vector<8x256xf32>
    %c0_11 = arith.constant 0 : index
    %c0_12 = arith.constant 0 : index
    %16 = vector.load %arg9[%c0_11, %c0_12] : memref<8x256xf32, #tpu.memory_space<vmem>>, vector<8x256xf32>
    tpu.vector_store %arg9[%c0_11, %c0_12], %15 {strides = array<i32>} : memref<8x256xf32, #tpu.memory_space<vmem>>, vector<8x256xf32>,
    %c0_i32_13 = arith.constant 0 : i32
    %17 = arith.cmpi eq, %arg2, %c0_i32_13 : i32
    %18 = arith.extui %17 : i1 to i32
    %c0_i32_14 = arith.constant 0 : i32
    %19 = arith.cmpi ne, %18, %c0_i32_14 : i32
    scf.if %19 {
      %c0_15 = arith.constant 0 : index
      %c0_16 = arith.constant 0 : index
      %20 = vector.load %arg9[%c0_15, %c0_16] : memref<8x256xf32, #tpu.memory_space<vmem>>, vector<8x256xf32>
      %c0_17 = arith.constant 0 : index
      %c0_18 = arith.constant 0 : index
      %21 = vector.load %arg5[%c0_17, %c0_18] : memref<1x256xf32, #tpu.memory_space<vmem>>, vector<1x256xf32>
      %cst_19 = arith.constant 0.000000e+00 : f32
      %22 = vector.broadcast %cst_19 : f32 to vector<1x256xf32>
      %23 = arith.maximumf %21, %22 : vector<1x256xf32>
      %cst_20 = arith.constant 8.000000e+00 : f32
      %24 = vector.broadcast %cst_20 : f32 to vector<1x256xf32>
      %25 = arith.mulf %24, %23 : vector<1x256xf32>
      %26 = vector.broadcast %25 : vector<1x256xf32> to vector<8x256xf32>
      %27 = arith.subf %20, %26 : vector<8x256xf32>
      %c0_21 = arith.constant 0 : index
      %c0_22 = arith.constant 0 : index
      %28 = vector.load %arg6[%c0_21, %c0_22] : memref<256x128xf32, #tpu.memory_space<vmem>>, vector<256x128xf32>
      %cst_23 = arith.constant dense<0.000000e+00> : vector<8x128xf32>
      %29 = tpu.matmul %27, %28, %cst_23 {dimension_numbers = #tpu.dot_dimension_numbers<[1], [0], [0], [1], [0, 0, 1, 1], [], []>} : vector<8x256xf32>, vector<256x128xf32>, vector<8x128xf32> -> vector<8x128xf32>
      %c0_24 = arith.constant 0 : index
      %c0_25 = arith.constant 0 : index
      %30 = vector.load %arg7[%c0_24, %c0_25] : memref<1x128xf32, #tpu.memory_space<vmem>>, vector<1x128xf32>
      %31 = vector.broadcast %30 : vector<1x128xf32> to vector<8x128xf32>
      %32 = arith.addf %29, %31 : vector<8x128xf32>
      %c0_26 = arith.constant 0 : index
      %c0_27 = arith.constant 0 : index
      %c0_28 = arith.constant 0 : index
      %33 = vector.load %arg8[%c0_26, %c0_27, %c0_28] : memref<1x8x128xf32, #tpu.memory_space<vmem>>, vector<1x8x128xf32>
      %34 = vector.shape_cast %33 : vector<1x8x128xf32> to vector<8x128xf32>
      %35 = vector.shape_cast %32 : vector<8x128xf32> to vector<1x8x128xf32>
      tpu.vector_store %arg8[%c0_26, %c0_27, %c0_28], %35 {strides = array<i32>} : memref<1x8x128xf32, #tpu.memory_space<vmem>>, vector<1x8x128xf32>,
    } else {
    }
    return
  }
  func.func @transform_0(%arg0: i32, %arg1: i32, %arg2: i32) -> (i32, i32, i32) {
    %c1_i32 = arith.constant 1 : i32
    %0 = arith.muli %arg1, %c1_i32 : i32
    %1 = arith.addi %0, %arg2 : i32
    %c0_i32 = arith.constant 0 : i32
    %c0_i32_0 = arith.constant 0 : i32
    return %arg0, %1, %c0_i32 : i32, i32, i32
  }
  func.func @transform_1(%arg0: i32, %arg1: i32, %arg2: i32) -> (i32, i32) {
    %c0_i32 = arith.constant 0 : i32
    %c0_i32_0 = arith.constant 0 : i32
    %c0_i32_1 = arith.constant 0 : i32
    return %c0_i32, %c0_i32_0 : i32, i32
  }
  func.func @transform_2(%arg0: i32, %arg1: i32, %arg2: i32) -> (i32, i32) {
    %c0_i32 = arith.constant 0 : i32
    %c0_i32_0 = arith.constant 0 : i32
    %c0_i32_1 = arith.constant 0 : i32
    return %c0_i32, %c0_i32_0 : i32, i32
  }
  func.func @transform_3(%arg0: i32, %arg1: i32, %arg2: i32) -> (i32, i32) {
    %c0_i32 = arith.constant 0 : i32
    %c0_i32_0 = arith.constant 0 : i32
    %c0_i32_1 = arith.constant 0 : i32
    return %c0_i32, %c0_i32_0 : i32, i32
  }
  func.func @transform_4(%arg0: i32, %arg1: i32, %arg2: i32) -> (i32, i32) {
    %c0_i32 = arith.constant 0 : i32
    %c0_i32_0 = arith.constant 0 : i32
    %c0_i32_1 = arith.constant 0 : i32
    return %c0_i32, %c0_i32_0 : i32, i32
  }
  func.func @transform_5(%arg0: i32, %arg1: i32, %arg2: i32) -> (i32, i32, i32) {
    %c0_i32 = arith.constant 0 : i32
    %c0_i32_0 = arith.constant 0 : i32
    return %arg1, %arg0, %c0_i32 : i32, i32, i32
  }
}

</mosaic_0001>

<bundles_post_ra>
// kernel: protein_model_forward.1
= control target key start
LH: loop header
LB: loop body
LE: loop exit
PB: predicated region body
PF: predicated region fallthrough
CT: control target
= control target key end

     0   :  { %10 = vsyncpa [#allocation4], 0  ;;  %s3300_s18 = smov [#allocation3]   ;;  %s3870_s0 = inlined_call_operand.vmem [shape: bf16[8,16,1280], index: 0, kind: input, shape index: {}]   ;;  %s3871_s1 = inlined_call_operand.hbm [shape: bf16[1280,256], index: 1, kind: input, shape index: {}]   ;;  %s3872_s2 = inlined_call_operand.vmem [shape: f32[1,256], index: 2, kind: input, shape index: {}]   ;;  %s3873_s3 = inlined_call_operand.vmem [shape: f32[256,128], index: 3, kind: input, shape index: {}]   ;;  %s3874_s4 = inlined_call_operand.vmem [shape: f32[1,128], index: 4, kind: input, shape index: {}]   ;;  %s3875_s5 = inlined_call_operand.vmem [shape: f32[1,8,128], index: 5, kind: output, shape index: {}]  }
   0x1   :  { %s27_s19 = sshll.u32 %s3300_s18, 4  ;;  %s3276_s22 = scalar_lea.hbm %s3871_s1, 20480  ;;  %s28_s19 = int_to_ptr.vmem [resolvable:$true] %s27_s19 }
   0x2   :  { %p3277_p0 = scmp.ne.s32.totalorder %s3871_s1, %s3276_s22  ;;  %p3280_p1 = scmp.lt.u32.totalorder %s3276_s22, %s3871_s1 }
   0x4   :  { %p3282_p2 = pnand %p3280_p1, %p3277_p0 }
   0x6   :  { %3285 = shalt.err (!%p3282_p2)
}
   0x7   :  { %s3286_s27 = scalar_lea.vmem %s28_s19, 20480  ;;  %p3291_p4 = scmp.lt.s32.totalorder %s28_s19, %s28_s19 }
   0x8   :  { %p3287_p3 = scmp.ne.s32.totalorder %s28_s19, %s3286_s27  ;;  %p3292_p5 = scmp.lt.s32.totalorder %s3286_s27, %s3286_s27 }
   0xa   :  { %p3293_p6 = por %p3292_p5, %p3291_p4 }
   0xc   :  { %p3294_p7 = pnand %p3293_p6, %p3287_p3 }
   0xe   :  { %3297 = shalt.err (!%p3294_p7)
}
   0xf   :  { %s3301_s28 = smov 128   ;;  %s3302_s29 = smov 8  }
  0x10   :  { %33 = dma.hbm_to_vmem [thread:$0]  %s3871_s1, 20480, %s28_s19, [#allocation4], %s3301_s28, %s3301_s28, %s3302_s29  }
  0x11   :  { %3298 = dma.done.wait [#allocation4], 20480  }
  0x12   :  { %3299 = vsyncadd [#allocation4], 4294946816  ;;  %v2916_v0 = vld [vmem:[#allocation3 + $0x4] ss:$8 sps:$4 sm:$0xff]   ;;  %v2920_v2 = vld [vmem:[#allocation3] ss:$8 sps:$4 sm:$0xff]  }
  0x13   :  { %v2918_v1 = vld [vmem:[#allocation3 + $0x204] ss:$8 sps:$4 sm:$0xff]   ;;  %1517 = vmatprep.subr.bf16.mxu1 %v2916_v0  ;;  %v2921_v3 = vld [vmem:[#allocation3 + $0x200] ss:$8 sps:$4 sm:$0xff]   ;;  %v2922_v4 = vld [vmem:[#allocation3 + $0x14] ss:$8 sps:$4 sm:$0xff]  }
  0x14   :  { %1743 = vmatprep.subr.bf16.mxu0 %v2918_v1  ;;  %1518 = vmatpush1.bf16.msra.mxu1 %v2920_v2  ;;  %v2924_v5 = vld [vmem:[#allocation3 + $0x214] ss:$8 sps:$4 sm:$0xff]   ;;  %v2926_v6 = vld [vmem:[#allocation3 + $0x10] ss:$8 sps:$4 sm:$0xff]   ;;  %v2928_v8 = vld [vmem:[#allocation3 + $0x24] ss:$8 sps:$4 sm:$0xff]  }
  0x15   :  { %1744 = vmatpush1.bf16.msra.mxu0 %v2921_v3  ;;  %1519 = vmatprep.subr.bf16.mxu1 %v2922_v4  ;;  %v2927_v7 = vld [vmem:[#allocation3 + $0x210] ss:$8 sps:$4 sm:$0xff]   ;;  %v2930_v9 = vld [vmem:[#allocation3 + $0x224] ss:$8 sps:$4 sm:$0xff]   ;;  %v2932_v10 = vld [vmem:[#allocation3 + $0x20] ss:$8 sps:$4 sm:$0xff]  }
  0x16   :  { %1745 = vmatprep.subr.bf16.mxu0 %v2924_v5  ;;  %v2933_v11 = vld [vmem:[#allocation3 + $0x220] ss:$8 sps:$4 sm:$0xff]   ;;  %v2934_v12 = vld [vmem:[#allocation3 + $0x34] ss:$8 sps:$4 sm:$0xff]   ;;  %v2938_v14 = vld [vmem:[#allocation3 + $0x30] ss:$8 sps:$4 sm:$0xff]  }
  0x17   :  { %v2936_v13 = vld [vmem:[#allocation3 + $0x234] ss:$8 sps:$4 sm:$0xff]   ;;  %v2939_v15 = vld [vmem:[#allocation3 + $0x230] ss:$8 sps:$4 sm:$0xff]   ;;  %v2940_v16 = vld [vmem:[#allocation3 + $0x44] ss:$8 sps:$4 sm:$0xff]  }
  0x18   :  { %1520 = vmatpush1.bf16.msra.mxu1 %v2926_v6  ;;  %v2942_v17 = vld [vmem:[#allocation3 + $0x244] ss:$8 sps:$4 sm:$0xff]   ;;  %v2944_v18 = vld [vmem:[#allocation3 + $0x40] ss:$8 sps:$4 sm:$0xff]   ;;  %v2946_v20 = vld [vmem:[#allocation3 + $0x54] ss:$8 sps:$4 sm:$0xff]  }
  0x19   :  { %1746 = vmatpush1.bf16.msra.mxu0 %v2927_v7  ;;  %1521 = vmatprep.subr.bf16.mxu1 %v2928_v8  ;;  %v2945_v19 = vld [vmem:[#allocation3 + $0x240] ss:$8 sps:$4 sm:$0xff]   ;;  %v2948_v21 = vld [vmem:[#allocation3 + $0x254] ss:$8 sps:$4 sm:$0xff]   ;;  %v2950_v22 = vld [vmem:[#allocation3 + $0x50] ss:$8 sps:$4 sm:$0xff]  }
  0x1a   :  { %1747 = vmatprep.subr.bf16.mxu0 %v2930_v9  ;;  %v2951_v23 = vld [vmem:[#allocation3 + $0x250] ss:$8 sps:$4 sm:$0xff]   ;;  %v2952_v24 = vld [vmem:[#allocation3 + $0x64] ss:$8 sps:$4 sm:$0xff]   ;;  %v2956_v26 = vld [vmem:[#allocation3 + $0x60] ss:$8 sps:$4 sm:$0xff]  }
  0x1b   :  { %v2954_v25 = vld [vmem:[#allocation3 + $0x264] ss:$8 sps:$4 sm:$0xff]   ;;  %v2957_v27 = vld [vmem:[#allocation3 + $0x260] ss:$8 sps:$4 sm:$0xff]   ;;  %v2958_v28 = vld [vmem:[#allocation3 + $0x74] ss:$8 sps:$4 sm:$0xff]  }
  0x1c   :  { %1522 = vmatpush1.bf16.msra.mxu1 %v2932_v10  ;;  %v2960_v29 = vld [vmem:[#allocation3 + $0x274] ss:$8 sps:$4 sm:$0xff]   ;;  %v2962_v30 = vld [vmem:[#allocation3 + $0x70] ss:$8 sps:$4 sm:$0xff]   ;;  %v2964_v32 = vld [vmem:[#allocation3 + $0x84] ss:$8 sps:$4 sm:$0xff]  }
  0x1d   :  { %1748 = vmatpush1.bf16.msra.mxu0 %v2933_v11  ;;  %1523 = vmatprep.subr.bf16.mxu1 %v2934_v12  ;;  %v2963_v31 = vld [vmem:[#allocation3 + $0x270] ss:$8 sps:$4 sm:$0xff]   ;;  %v2966_v33 = vld [vmem:[#allocation3 + $0x284] ss:$8 sps:$4 sm:$0xff]   ;;  %v2968_v34 = vld [vmem:[#allocation3 + $0x80] ss:$8 sps:$4 sm:$0xff]  }
  0x1e   :  { %1749 = vmatprep.subr.bf16.mxu0 %v2936_v13  ;;  %v2969_v35 = vld [vmem:[#allocation3 + $0x280] ss:$8 sps:$4 sm:$0xff]   ;;  %v2970_v36 = vld [vmem:[#allocation3 + $0x94] ss:$8 sps:$4 sm:$0xff]   ;;  %v2974_v38 = vld [vmem:[#allocation3 + $0x90] ss:$8 sps:$4 sm:$0xff]  }
  0x1f   :  { %v2972_v37 = vld [vmem:[#allocation3 + $0x294] ss:$8 sps:$4 sm:$0xff]   ;;  %v2975_v39 = vld [vmem:[#allocation3 + $0x290] ss:$8 sps:$4 sm:$0xff]   ;;  %v2976_v40 = vld [vmem:[#allocation3 + $0xa4] ss:$8 sps:$4 sm:$0xff]  }
  0x20   :  { %1524 = vmatpush1.bf16.msra.mxu1 %v2938_v14  ;;  %v2978_v41 = vld [vmem:[#allocation3 + $0x2a4] ss:$8 sps:$4 sm:$0xff]   ;;  %v2980_v42 = vld [vmem:[#allocation3 + $0xa0] ss:$8 sps:$4 sm:$0xff]   ;;  %v2982_v44 = vld [vmem:[#allocation3 + $0xb4] ss:$8 sps:$4 sm:$0xff]  }
  0x21   :  { %1750 = vmatpush1.bf16.msra.mxu0 %v2939_v15  ;;  %1525 = vmatprep.subr.bf16.mxu1 %v2940_v16  ;;  %v2981_v43 = vld [vmem:[#allocation3 + $0x2a0] ss:$8 sps:$4 sm:$0xff]   ;;  %v2984_v45 = vld [vmem:[#allocation3 + $0x2b4] ss:$8 sps:$4 sm:$0xff]   ;;  %v2986_v46 = vld [vmem:[#allocation3 + $0xb0] ss:$8 sps:$4 sm:$0xff]  }
  0x22   :  { %1751 = vmatprep.subr.bf16.mxu0 %v2942_v17  ;;  %v2987_v47 = vld [vmem:[#allocation3 + $0x2b0] ss:$8 sps:$4 sm:$0xff]   ;;  %v2988_v48 = vld [vmem:[#allocation3 + $0xc4] ss:$8 sps:$4 sm:$0xff]   ;;  %v3017_v51 = vld [vmem:[%s3870_s0 + $0x14] ss:$40 sps:$4 sm:$0xff]  }
  0x23   :  { %v3014_v49 = vld [vmem:[%s3870_s0 + $0x4] ss:$40 sps:$4 sm:$0xff]   ;;  %v2992_v52 = vld [vmem:[#allocation3 + $0xc0] ss:$8 sps:$4 sm:$0xff]   ;;  %1775 = vmatprep.mubr.bf16.mxu0 %v3017_v51  ;;  %v2994_v54 = vld [vmem:[#allocation3 + $0xd4] ss:$8 sps:$4 sm:$0xff]  }
  0x24   :  { %1526 = vmatpush1.bf16.msra.mxu1 %v2944_v18  ;;  %v2990_v50 = vld [vmem:[#allocation3 + $0x2c4] ss:$8 sps:$4 sm:$0xff]   ;;  %1549 = vmatprep.mubr.bf16.mxu1 %v3014_v49  ;;  %v2993_v53 = vld [vmem:[#allocation3 + $0x2c0] ss:$8 sps:$4 sm:$0xff]   ;;  %v2996_v55 = vld [vmem:[#allocation3 + $0x2d4] ss:$8 sps:$4 sm:$0xff]  }
  0x25   :  { %1752 = vmatpush1.bf16.msra.mxu0 %v2945_v19  ;;  %1527 = vmatprep.subr.bf16.mxu1 %v2946_v20  ;;  %v2998_v56 = vld [vmem:[#allocation3 + $0xd0] ss:$8 sps:$4 sm:$0xff]   ;;  %v3000_v58 = vld [vmem:[#allocation3 + $0xe4] ss:$8 sps:$4 sm:$0xff]   ;;  %v3004_v60 = vld [vmem:[#allocation3 + $0xe0] ss:$8 sps:$4 sm:$0xff]  }
  0x26   :  { %1753 = vmatprep.subr.bf16.mxu0 %v2948_v21  ;;  %v2999_v57 = vld [vmem:[#allocation3 + $0x2d0] ss:$8 sps:$4 sm:$0xff]   ;;  %v3002_v59 = vld [vmem:[#allocation3 + $0x2e4] ss:$8 sps:$4 sm:$0xff]   ;;  %v3005_v61 = vld [vmem:[#allocation3 + $0x2e0] ss:$8 sps:$4 sm:$0xff]  }
  0x27   :  { %v3006_v62 = vld [vmem:[#allocation3 + $0xf4] ss:$8 sps:$4 sm:$0xff]   ;;  %v3010_v0 = vld [vmem:[#allocation3 + $0xf0] ss:$8 sps:$4 sm:$0xff]   ;;  %v3020_v2 = vld [vmem:[#allocation3 + $0x104] ss:$8 sps:$4 sm:$0xff]  }
  0x28   :  { %1528 = vmatpush1.bf16.msra.mxu1 %v2950_v22  ;;  %v3008_v63 = vld [vmem:[#allocation3 + $0x2f4] ss:$8 sps:$4 sm:$0xff]   ;;  %v3011_v1 = vld [vmem:[#allocation3 + $0x2f0] ss:$8 sps:$4 sm:$0xff]   ;;  %v3023_v3 = vld [vmem:[#allocation3 + $0x304] ss:$8 sps:$4 sm:$0xff]  }
  0x29   :  { %1754 = vmatpush1.bf16.msra.mxu0 %v2951_v23  ;;  %1529 = vmatprep.subr.bf16.mxu1 %v2952_v24  ;;  %v3012_v4 = vld [vmem:[%s3870_s0] ss:$40 sps:$4 sm:$0xff]   ;;  %v3015_v5 = vld [vmem:[%s3870_s0 + $0x10] ss:$40 sps:$4 sm:$0xff]   ;;  %v3026_v8 = vld [vmem:[#allocation3 + $0x114] ss:$8 sps:$4 sm:$0xff]  }
  0x2a   :  { %1755 = vmatprep.subr.bf16.mxu0 %v2954_v25  ;;  %v3018_v6 = vld [vmem:[#allocation3 + $0x100] ss:$8 sps:$4 sm:$0xff]   ;;  %v3029_v9 = vld [vmem:[#allocation3 + $0x314] ss:$8 sps:$4 sm:$0xff]   ;;  %v3032_v11 = vld [vmem:[%s3870_s0 + $0x64] ss:$40 sps:$4 sm:$0xff]  }
  0x2b   :  { %v3021_v7 = vld [vmem:[#allocation3 + $0x300] ss:$8 sps:$4 sm:$0xff]   ;;  %v3030_v10 = vld [vmem:[%s3870_s0 + $0x54] ss:$40 sps:$4 sm:$0xff]   ;;  %v3024_v12 = vld [vmem:[#allocation3 + $0x110] ss:$8 sps:$4 sm:$0xff]  }
  0x2c   :  { %1530 = vmatpush1.bf16.msra.mxu1 %v2956_v26  ;;  %v3027_v13 = vld [vmem:[#allocation3 + $0x310] ss:$8 sps:$4 sm:$0xff]   ;;  %v3037_v14 = vld [vmem:[#allocation3 + $0x124] ss:$8 sps:$4 sm:$0xff]   ;;  %v3035_v17 = vld [vmem:[#allocation3 + $0x120] ss:$8 sps:$4 sm:$0xff]  }
  0x2d   :  { %1756 = vmatpush1.bf16.msra.mxu0 %v2957_v27  ;;  %1531 = vmatprep.subr.bf16.mxu1 %v2958_v28  ;;  %v3041_v15 = vld [vmem:[#allocation3 + $0x324] ss:$8 sps:$4 sm:$0xff]   ;;  %v3034_v16 = vld [vmem:[%s3870_s0 + $0x50] ss:$40 sps:$4 sm:$0xff]   ;;  %v3038_v18 = vld [vmem:[%s3870_s0 + $0x60] ss:$40 sps:$4 sm:$0xff]  }
  0x2e   :  { %1757 = vmatprep.subr.bf16.mxu0 %v2960_v29  ;;  %v3039_v19 = vld [vmem:[#allocation3 + $0x320] ss:$8 sps:$4 sm:$0xff]   ;;  %v3044_v20 = vld [vmem:[#allocation3 + $0x134] ss:$8 sps:$4 sm:$0xff]   ;;  %v3048_v22 = vld [vmem:[%s3870_s0 + $0xa4] ss:$40 sps:$4 sm:$0xff]  }
  0x2f   :  { %v3047_v21 = vld [vmem:[#allocation3 + $0x334] ss:$8 sps:$4 sm:$0xff]   ;;  %v3042_v24 = vld [vmem:[#allocation3 + $0x130] ss:$8 sps:$4 sm:$0xff]   ;;  %v3055_v26 = vld [vmem:[#allocation3 + $0x144] ss:$8 sps:$4 sm:$0xff]  }
  0x30   :  { %1532 = vmatpush1.bf16.msra.mxu1 %v2962_v30  ;;  %v3050_v23 = vld [vmem:[%s3870_s0 + $0xb4] ss:$40 sps:$4 sm:$0xff]   ;;  %v3045_v25 = vld [vmem:[#allocation3 + $0x330] ss:$8 sps:$4 sm:$0xff]   ;;  %v3059_v27 = vld [vmem:[#allocation3 + $0x344] ss:$8 sps:$4 sm:$0xff]  }
  0x31   :  { %1758 = vmatpush1.bf16.msra.mxu0 %v2963_v31  ;;  %1533 = vmatprep.subr.bf16.mxu1 %v2964_v32  ;;  %v3052_v28 = vld [vmem:[%s3870_s0 + $0xa0] ss:$40 sps:$4 sm:$0xff]   ;;  %v3056_v30 = vld [vmem:[%s3870_s0 + $0xb0] ss:$40 sps:$4 sm:$0xff]   ;;  %v3062_v32 = vld [vmem:[#allocation3 + $0x154] ss:$8 sps:$4 sm:$0xff]  }
  0x32   :  { %1759 = vmatprep.subr.bf16.mxu0 %v2966_v33  ;;  %v3053_v29 = vld [vmem:[#allocation3 + $0x140] ss:$8 sps:$4 sm:$0xff]   ;;  %v3065_v33 = vld [vmem:[#allocation3 + $0x354] ss:$8 sps:$4 sm:$0xff]   ;;  %v3081_v49 = vld [vmem:[#allocation3 + $0x370] ss:$8 sps:$4 sm:$0xff]  }
  0x33   :  { %v3057_v31 = vld [vmem:[#allocation3 + $0x340] ss:$8 sps:$4 sm:$0xff]   ;;  %v3095_v51 = vld [vmem:[#allocation3 + $0x384] ss:$8 sps:$4 sm:$0xff]   ;;  %vm2244_vm0 = vcmask 1041409   ;;  %vm2246_vm1 = vcmask 1042434  }
  0x34   :  { %1534 = vmatpush1.bf16.msra.mxu1 %v2968_v34  ;;  %v3066_v34 = vld [vmem:[%s3870_s0 + $0xf4] ss:$40 sps:$4 sm:$0xff]   ;;  %vm2248_vm2 = vcmask 1043459   ;;  %vm2250_vm3 = vcmask 1044484   ;;  %vm2252_vm4 = vcmask 1045509   ;;  %vm2254_vm5 = vcmask 1046534  }
  0x35   :  { %1760 = vmatpush1.bf16.msra.mxu0 %v2969_v35  ;;  %1535 = vmatprep.subr.bf16.mxu1 %v2970_v36  ;;  %v3068_v35 = vld [vmem:[%s3870_s0 + $0x104] ss:$40 sps:$4 sm:$0xff]   ;;  %v3060_v36 = vld [vmem:[#allocation3 + $0x150] ss:$8 sps:$4 sm:$0xff]   ;;  %vm2256_vm6 = vcmask 1047559  }
  0x36   :  { %1761 = vmatprep.subr.bf16.mxu0 %v2972_v37  ;;  %v3063_v37 = vld [vmem:[#allocation3 + $0x350] ss:$8 sps:$4 sm:$0xff]  }
  0x38   :  { %1536 = vmatpush1.bf16.msra.mxu1 %v2974_v38  ;;  %v3073_v38 = vld [vmem:[#allocation3 + $0x164] ss:$8 sps:$4 sm:$0xff]  }
  0x39   :  { %1762 = vmatpush1.bf16.msra.mxu0 %v2975_v39  ;;  %1537 = vmatprep.subr.bf16.mxu1 %v2976_v40  ;;  %v3077_v39 = vld [vmem:[#allocation3 + $0x364] ss:$8 sps:$4 sm:$0xff]   ;;  %v3070_v40 = vld [vmem:[%s3870_s0 + $0xf0] ss:$40 sps:$4 sm:$0xff]  }
  0x3a   :  { %1763 = vmatprep.subr.bf16.mxu0 %v2978_v41  ;;  %v3071_v41 = vld [vmem:[#allocation3 + $0x160] ss:$8 sps:$4 sm:$0xff]  }
  0x3c   :  { %1538 = vmatpush1.bf16.msra.mxu1 %v2980_v42  ;;  %v3074_v42 = vld [vmem:[%s3870_s0 + $0x100] ss:$40 sps:$4 sm:$0xff]  }
  0x3d   :  { %1764 = vmatpush1.bf16.msra.mxu0 %v2981_v43  ;;  %1539 = vmatprep.subr.bf16.mxu1 %v2982_v44  ;;  %v3075_v43 = vld [vmem:[#allocation3 + $0x360] ss:$8 sps:$4 sm:$0xff]   ;;  %v3080_v44 = vld [vmem:[#allocation3 + $0x174] ss:$8 sps:$4 sm:$0xff]  }
  0x3e   :  { %1765 = vmatprep.subr.bf16.mxu0 %v2984_v45  ;;  %v3083_v45 = vld [vmem:[#allocation3 + $0x374] ss:$8 sps:$4 sm:$0xff]  }
  0x40   :  { %1540 = vmatpush1.bf16.msra.mxu1 %v2986_v46  ;;  %v3084_v46 = vld [vmem:[%s3870_s0 + $0x144] ss:$40 sps:$4 sm:$0xff]  }
  0x41   :  { %1766 = vmatpush1.bf16.msra.mxu0 %v2987_v47  ;;  %1541 = vmatprep.subr.bf16.mxu1 %v2988_v48  ;;  %v3086_v47 = vld [vmem:[%s3870_s0 + $0x154] ss:$40 sps:$4 sm:$0xff]   ;;  %v3078_v48 = vld [vmem:[#allocation3 + $0x170] ss:$8 sps:$4 sm:$0xff]  }
  0x42   :  { %1767 = vmatprep.subr.bf16.mxu0 %v2990_v50  ;;  %v3091_v50 = vld [vmem:[#allocation3 + $0x184] ss:$8 sps:$4 sm:$0xff]  }
  0x44   :  { %1542 = vmatpush1.bf16.msra.mxu1 %v2992_v52  ;;  %v3088_v52 = vld [vmem:[%s3870_s0 + $0x140] ss:$40 sps:$4 sm:$0xff]  }
  0x45   :  { %1768 = vmatpush1.bf16.msra.mxu0 %v2993_v53  ;;  %1543 = vmatprep.subr.bf16.mxu1 %v2994_v54  ;;  %v3089_v53 = vld [vmem:[#allocation3 + $0x180] ss:$8 sps:$4 sm:$0xff]   ;;  %v3092_v54 = vld [vmem:[%s3870_s0 + $0x150] ss:$40 sps:$4 sm:$0xff]  }
  0x46   :  { %1769 = vmatprep.subr.bf16.mxu0 %v2996_v55  ;;  %v3093_v55 = vld [vmem:[#allocation3 + $0x380] ss:$8 sps:$4 sm:$0xff]  }
  0x48   :  { %1544 = vmatpush1.bf16.msra.mxu1 %v2998_v56  ;;  %v3098_v56 = vld [vmem:[#allocation3 + $0x194] ss:$8 sps:$4 sm:$0xff]  }
  0x49   :  { %1770 = vmatpush1.bf16.msra.mxu0 %v2999_v57  ;;  %1545 = vmatprep.subr.bf16.mxu1 %v3000_v58  ;;  %v3101_v57 = vld [vmem:[#allocation3 + $0x394] ss:$8 sps:$4 sm:$0xff]  }
  0x4a   :  { %1771 = vmatprep.subr.bf16.mxu0 %v3002_v59  ;;  %v3102_v58 = vld [vmem:[%s3870_s0 + $0x194] ss:$40 sps:$4 sm:$0xff]   ;;  %v3104_v59 = vld [vmem:[%s3870_s0 + $0x1a4] ss:$40 sps:$4 sm:$0xff]  }
  0x4c   :  { %1546 = vmatpush1.bf16.msra.mxu1 %v3004_v60  ;;  %v3096_v60 = vld [vmem:[#allocation3 + $0x190] ss:$8 sps:$4 sm:$0xff]  }
  0x4d   :  { %1772 = vmatpush1.bf16.msra.mxu0 %v3005_v61  ;;  %1547 = vmatprep.subr.bf16.mxu1 %v3006_v62  ;;  %v3099_v61 = vld [vmem:[#allocation3 + $0x390] ss:$8 sps:$4 sm:$0xff]   ;;  %v3109_v62 = vld [vmem:[#allocation3 + $0x1a4] ss:$8 sps:$4 sm:$0xff]  }
  0x4e   :  { %1773 = vmatprep.subr.bf16.mxu0 %v3008_v63  ;;  %v3113_v63 = vld [vmem:[#allocation3 + $0x3a4] ss:$8 sps:$4 sm:$0xff]  }
  0x50   :  { %1548 = vmatpush1.bf16.msra.mxu1 %v3010_v0  ;;  %v3106_v0 = vld [vmem:[%s3870_s0 + $0x190] ss:$40 sps:$4 sm:$0xff]  }
  0x51   :  { %1774 = vmatpush1.bf16.msra.mxu0 %v3011_v1  ;;  %1630 = vmatprep.subr.bf16.mxu1 %v3020_v2  ;;  %v3107_v1 = vld [vmem:[#allocation3 + $0x1a0] ss:$8 sps:$4 sm:$0xff]  }
  0x52   :  { %1856 = vmatprep.subr.bf16.mxu0 %v3023_v3  ;;  %v3110_v2 = vld [vmem:[%s3870_s0 + $0x1a0] ss:$40 sps:$4 sm:$0xff]  }
  0x53   :  { %1550 = vmatmul.mubr.bf16.vlgmr.msra.gmra.mrb[0].mxu1 %v3012_v4  ;;  %v3111_v3 = vld [vmem:[#allocation3 + $0x3a0] ss:$8 sps:$4 sm:$0xff]   ;;  %v3116_v4 = vld [vmem:[#allocation3 + $0x1b4] ss:$8 sps:$4 sm:$0xff]  }
  0x54   :  { %1776 = vmatmul.mubr.bf16.vlgmr.msra.gmra.mrb[0].mxu0 %v3015_v5  ;;  %1631 = vmatpush1.bf16.msra.mxu1 %v3018_v6  ;;  %v3119_v5 = vld [vmem:[#allocation3 + $0x3b4] ss:$8 sps:$4 sm:$0xff]   ;;  %v3120_v6 = vld [vmem:[%s3870_s0 + $0x1e4] ss:$40 sps:$4 sm:$0xff]  }
  0x55   :  { %1857 = vmatpush1.bf16.msra.mxu0 %v3021_v7  ;;  %1632 = vmatprep.subr.bf16.mxu1 %v3026_v8  ;;  %v3122_v7 = vld [vmem:[%s3870_s0 + $0x1f4] ss:$40 sps:$4 sm:$0xff]   ;;  %v3114_v8 = vld [vmem:[#allocation3 + $0x1b0] ss:$8 sps:$4 sm:$0xff]  }
  0x56   :  { %1858 = vmatprep.subr.bf16.mxu0 %v3029_v9  ;;  %1559 = vmatprep.mubr.bf16.mxu1 %v3030_v10  ;;  %v3117_v9 = vld [vmem:[#allocation3 + $0x3b0] ss:$8 sps:$4 sm:$0xff]   ;;  %v3127_v10 = vld [vmem:[#allocation3 + $0x1c4] ss:$8 sps:$4 sm:$0xff]  }
  0x57   :  { %1785 = vmatprep.mubr.bf16.mxu0 %v3032_v11  ;;  %v3131_v11 = vld [vmem:[#allocation3 + $0x3c4] ss:$8 sps:$4 sm:$0xff]  }
  0x58   :  { %1633 = vmatpush1.bf16.msra.mxu1 %v3024_v12  ;;  %v3124_v12 = vld [vmem:[%s3870_s0 + $0x1e0] ss:$40 sps:$4 sm:$0xff]  }
  0x59   :  { %1859 = vmatpush1.bf16.msra.mxu0 %v3027_v13  ;;  %1634 = vmatprep.subr.bf16.mxu1 %v3037_v14  ;;  %v3125_v13 = vld [vmem:[#allocation3 + $0x1c0] ss:$8 sps:$4 sm:$0xff]   ;;  %v3128_v14 = vld [vmem:[%s3870_s0 + $0x1f0] ss:$40 sps:$4 sm:$0xff]  }
  0x5a   :  { %1860 = vmatprep.subr.bf16.mxu0 %v3041_v15  ;;  %v3129_v15 = vld [vmem:[#allocation3 + $0x3c0] ss:$8 sps:$4 sm:$0xff]  }
  0x5b   :  { %1560 = vmatmul.mubr.bf16.gmra.mrb[4].mxu1 %v3034_v16  ;;  %v3134_v16 = vld [vmem:[#allocation3 + $0x1d4] ss:$8 sps:$4 sm:$0xff]  }
  0x5c   :  { %1786 = vmatmul.mubr.bf16.gmra.mrb[4].mxu0 %v3038_v18  ;;  %1635 = vmatpush1.bf16.msra.mxu1 %v3035_v17  ;;  %v3137_v17 = vld [vmem:[#allocation3 + $0x3d4] ss:$8 sps:$4 sm:$0xff]  }
  0x5d   :  { %1861 = vmatpush1.bf16.msra.mxu0 %v3039_v19  ;;  %1636 = vmatprep.subr.bf16.mxu1 %v3044_v20  ;;  %v3138_v18 = vld [vmem:[%s3870_s0 + $0x234] ss:$40 sps:$4 sm:$0xff]   ;;  %v3140_v19 = vld [vmem:[%s3870_s0 + $0x244] ss:$40 sps:$4 sm:$0xff]   ;;  %v3132_v20 = vld [vmem:[#allocation3 + $0x1d0] ss:$8 sps:$4 sm:$0xff]  }
  0x5e   :  { %1862 = vmatprep.subr.bf16.mxu0 %v3047_v21  ;;  %1569 = vmatprep.mubr.bf16.mxu1 %v3048_v22  ;;  %v3135_v21 = vld [vmem:[#allocation3 + $0x3d0] ss:$8 sps:$4 sm:$0xff]   ;;  %v3145_v22 = vld [vmem:[#allocation3 + $0x1e4] ss:$8 sps:$4 sm:$0xff]  }
  0x5f   :  { %1795 = vmatprep.mubr.bf16.mxu0 %v3050_v23  ;;  %v3149_v23 = vld [vmem:[#allocation3 + $0x3e4] ss:$8 sps:$4 sm:$0xff]  }
  0x60   :  { %1637 = vmatpush1.bf16.msra.mxu1 %v3042_v24  ;;  %v3142_v24 = vld [vmem:[%s3870_s0 + $0x230] ss:$40 sps:$4 sm:$0xff]  }
  0x61   :  { %1863 = vmatpush1.bf16.msra.mxu0 %v3045_v25  ;;  %1638 = vmatprep.subr.bf16.mxu1 %v3055_v26  ;;  %v3143_v25 = vld [vmem:[#allocation3 + $0x1e0] ss:$8 sps:$4 sm:$0xff]  }
  0x62   :  { %1864 = vmatprep.subr.bf16.mxu0 %v3059_v27  ;;  %v3146_v26 = vld [vmem:[%s3870_s0 + $0x240] ss:$40 sps:$4 sm:$0xff]  }
  0x63   :  { %1570 = vmatmul.mubr.bf16.gmra.mrb[8].mxu1 %v3052_v28  ;;  %v3147_v27 = vld [vmem:[#allocation3 + $0x3e0] ss:$8 sps:$4 sm:$0xff]   ;;  %v3152_v28 = vld [vmem:[#allocation3 + $0x1f4] ss:$8 sps:$4 sm:$0xff]  }
  0x64   :  { %1796 = vmatmul.mubr.bf16.gmra.mrb[8].mxu0 %v3056_v30  ;;  %1639 = vmatpush1.bf16.msra.mxu1 %v3053_v29  ;;  %v3155_v29 = vld [vmem:[#allocation3 + $0x3f4] ss:$8 sps:$4 sm:$0xff]  }
  0x65   :  { %1865 = vmatpush1.bf16.msra.mxu0 %v3057_v31  ;;  %1640 = vmatprep.subr.bf16.mxu1 %v3062_v32  ;;  %v3158_v30 = vld [vmem:[%s3870_s0 + $0xc] ss:$40 sps:$4 sm:$0xff]   ;;  %v3161_v31 = vld [vmem:[%s3870_s0 + $0x1c] ss:$40 sps:$4 sm:$0xff]   ;;  %v3150_v32 = vld [vmem:[#allocation3 + $0x1f0] ss:$8 sps:$4 sm:$0xff]  }
  0x66   :  { %1866 = vmatprep.subr.bf16.mxu0 %v3065_v33  ;;  %1579 = vmatprep.mubr.bf16.mxu1 %v3066_v34  ;;  %v3153_v33 = vld [vmem:[#allocation3 + $0x3f0] ss:$8 sps:$4 sm:$0xff]   ;;  %v3164_v34 = vld [vmem:[#allocation3 + $0x404] ss:$8 sps:$4 sm:$0xff]  }
  0x67   :  { %1805 = vmatprep.mubr.bf16.mxu0 %v3068_v35  ;;  %v3156_v35 = vld [vmem:[%s3870_s0 + $0x8] ss:$40 sps:$4 sm:$0xff]  }
  0x68   :  { %1641 = vmatpush1.bf16.msra.mxu1 %v3060_v36  ;;  %v3159_v36 = vld [vmem:[%s3870_s0 + $0x18] ss:$40 sps:$4 sm:$0xff]  }
  0x69   :  { %1867 = vmatpush1.bf16.msra.mxu0 %v3063_v37  ;;  %1642 = vmatprep.subr.bf16.mxu1 %v3073_v38  ;;  %v3162_v37 = vld [vmem:[#allocation3 + $0x400] ss:$8 sps:$4 sm:$0xff]   ;;  %v3167_v38 = vld [vmem:[#allocation3 + $0x414] ss:$8 sps:$4 sm:$0xff]  }
  0x6a   :  { %1868 = vmatprep.subr.bf16.mxu0 %v3077_v39  ;;  %v3168_v39 = vld [vmem:[%s3870_s0 + $0x5c] ss:$40 sps:$4 sm:$0xff]  }
  0x6b   :  { %1580 = vmatmul.mubr.bf16.gmra.mrb[12].mxu1 %v3070_v40  ;;  %v3170_v40 = vld [vmem:[%s3870_s0 + $0x6c] ss:$40 sps:$4 sm:$0xff]  }
  0x6c   :  { %1806 = vmatmul.mubr.bf16.gmra.mrb[12].mxu0 %v3074_v42  ;;  %1643 = vmatpush1.bf16.msra.mxu1 %v3071_v41  ;;  %v3165_v41 = vld [vmem:[#allocation3 + $0x410] ss:$8 sps:$4 sm:$0xff]   ;;  %v3176_v42 = vld [vmem:[#allocation3 + $0x424] ss:$8 sps:$4 sm:$0xff]  }
  0x6d   :  { %1869 = vmatpush1.bf16.msra.mxu0 %v3075_v43  ;;  %1644 = vmatprep.subr.bf16.mxu1 %v3080_v44  ;;  %v3172_v43 = vld [vmem:[%s3870_s0 + $0x58] ss:$40 sps:$4 sm:$0xff]   ;;  %v3173_v44 = vld [vmem:[%s3870_s0 + $0x68] ss:$40 sps:$4 sm:$0xff]  }
  0x6e   :  { %1870 = vmatprep.subr.bf16.mxu0 %v3083_v45  ;;  %1589 = vmatprep.mubr.bf16.mxu1 %v3084_v46  ;;  %v3174_v45 = vld [vmem:[#allocation3 + $0x420] ss:$8 sps:$4 sm:$0xff]   ;;  %v3179_v46 = vld [vmem:[#allocation3 + $0x434] ss:$8 sps:$4 sm:$0xff]  }
  0x6f   :  { %1815 = vmatprep.mubr.bf16.mxu0 %v3086_v47  ;;  %v3180_v47 = vld [vmem:[%s3870_s0 + $0xac] ss:$40 sps:$4 sm:$0xff]  }
  0x70   :  { %1645 = vmatpush1.bf16.msra.mxu1 %v3078_v48  ;;  %v3182_v48 = vld [vmem:[%s3870_s0 + $0xbc] ss:$40 sps:$4 sm:$0xff]  }
  0x71   :  { %1871 = vmatpush1.bf16.msra.mxu0 %v3081_v49  ;;  %1646 = vmatprep.subr.bf16.mxu1 %v3091_v50  ;;  %v3177_v49 = vld [vmem:[#allocation3 + $0x430] ss:$8 sps:$4 sm:$0xff]   ;;  %v3188_v50 = vld [vmem:[#allocation3 + $0x444] ss:$8 sps:$4 sm:$0xff]  }
  0x72   :  { %1872 = vmatprep.subr.bf16.mxu0 %v3095_v51  ;;  %v3184_v51 = vld [vmem:[%s3870_s0 + $0xa8] ss:$40 sps:$4 sm:$0xff]  }
  0x73   :  { %1590 = vmatmul.mubr.bf16.gmra.mrb[16].mxu1 %v3088_v52  ;;  %v3185_v52 = vld [vmem:[%s3870_s0 + $0xb8] ss:$40 sps:$4 sm:$0xff]  }
  0x74   :  { %1816 = vmatmul.mubr.bf16.gmra.mrb[16].mxu0 %v3092_v54  ;;  %1647 = vmatpush1.bf16.msra.mxu1 %v3089_v53  ;;  %v3186_v53 = vld [vmem:[#allocation3 + $0x440] ss:$8 sps:$4 sm:$0xff]   ;;  %v3191_v54 = vld [vmem:[#allocation3 + $0x454] ss:$8 sps:$4 sm:$0xff]  }
  0x75   :  { %1873 = vmatpush1.bf16.msra.mxu0 %v3093_v55  ;;  %1648 = vmatprep.subr.bf16.mxu1 %v3098_v56  ;;  %v3192_v55 = vld [vmem:[%s3870_s0 + $0xfc] ss:$40 sps:$4 sm:$0xff]   ;;  %v3194_v56 = vld [vmem:[%s3870_s0 + $0x10c] ss:$40 sps:$4 sm:$0xff]  }
  0x76   :  { %1874 = vmatprep.subr.bf16.mxu0 %v3101_v57  ;;  %1599 = vmatprep.mubr.bf16.mxu1 %v3102_v58  ;;  %v3189_v57 = vld [vmem:[#allocation3 + $0x450] ss:$8 sps:$4 sm:$0xff]   ;;  %v3200_v58 = vld [vmem:[#allocation3 + $0x464] ss:$8 sps:$4 sm:$0xff]  }
  0x77   :  { %1825 = vmatprep.mubr.bf16.mxu0 %v3104_v59  ;;  %v3196_v59 = vld [vmem:[%s3870_s0 + $0xf8] ss:$40 sps:$4 sm:$0xff]  }
  0x78   :  { %1649 = vmatpush1.bf16.msra.mxu1 %v3096_v60  ;;  %v3197_v60 = vld [vmem:[%s3870_s0 + $0x108] ss:$40 sps:$4 sm:$0xff]  }
  0x79   :  { %1875 = vmatpush1.bf16.msra.mxu0 %v3099_v61  ;;  %1650 = vmatprep.subr.bf16.mxu1 %v3109_v62  ;;  %v3198_v61 = vld [vmem:[#allocation3 + $0x460] ss:$8 sps:$4 sm:$0xff]   ;;  %v3203_v62 = vld [vmem:[#allocation3 + $0x474] ss:$8 sps:$4 sm:$0xff]  }
  0x7a   :  { %1876 = vmatprep.subr.bf16.mxu0 %v3113_v63  ;;  %v3204_v63 = vld [vmem:[%s3870_s0 + $0x14c] ss:$40 sps:$4 sm:$0xff]  }
  0x7b   :  { %1600 = vmatmul.mubr.bf16.gmra.mrb[20].mxu1 %v3106_v0  ;;  %v3206_v0 = vld [vmem:[%s3870_s0 + $0x15c] ss:$40 sps:$4 sm:$0xff]  }
  0x7c   :  { %1826 = vmatmul.mubr.bf16.gmra.mrb[20].mxu0 %v3110_v2  ;;  %1651 = vmatpush1.bf16.msra.mxu1 %v3107_v1  ;;  %v3201_v1 = vld [vmem:[#allocation3 + $0x470] ss:$8 sps:$4 sm:$0xff]   ;;  %v3212_v2 = vld [vmem:[#allocation3 + $0x484] ss:$8 sps:$4 sm:$0xff]  }
  0x7d   :  { %1877 = vmatpush1.bf16.msra.mxu0 %v3111_v3  ;;  %1652 = vmatprep.subr.bf16.mxu1 %v3116_v4  ;;  %v3208_v3 = vld [vmem:[%s3870_s0 + $0x148] ss:$40 sps:$4 sm:$0xff]   ;;  %v3209_v4 = vld [vmem:[%s3870_s0 + $0x158] ss:$40 sps:$4 sm:$0xff]  }
  0x7e   :  { %1878 = vmatprep.subr.bf16.mxu0 %v3119_v5  ;;  %1609 = vmatprep.mubr.bf16.mxu1 %v3120_v6  ;;  %v3210_v5 = vld [vmem:[#allocation3 + $0x480] ss:$8 sps:$4 sm:$0xff]   ;;  %v3215_v6 = vld [vmem:[#allocation3 + $0x494] ss:$8 sps:$4 sm:$0xff]  }
  0x7f   :  { %1835 = vmatprep.mubr.bf16.mxu0 %v3122_v7  ;;  %v3216_v7 = vld [vmem:[%s3870_s0 + $0x19c] ss:$40 sps:$4 sm:$0xff]  }
  0x80   :  { %1653 = vmatpush1.bf16.msra.mxu1 %v3114_v8  ;;  %v3218_v8 = vld [vmem:[%s3870_s0 + $0x1ac] ss:$40 sps:$4 sm:$0xff]  }
  0x81   :  { %1879 = vmatpush1.bf16.msra.mxu0 %v3117_v9  ;;  %1654 = vmatprep.subr.bf16.mxu1 %v3127_v10  ;;  %v3213_v9 = vld [vmem:[#allocation3 + $0x490] ss:$8 sps:$4 sm:$0xff]   ;;  %v3224_v10 = vld [vmem:[#allocation3 + $0x4a4] ss:$8 sps:$4 sm:$0xff]  }
  0x82   :  { %1880 = vmatprep.subr.bf16.mxu0 %v3131_v11  ;;  %v3220_v11 = vld [vmem:[%s3870_s0 + $0x198] ss:$40 sps:$4 sm:$0xff]  }
  0x83   :  { %1610 = vmatmul.mubr.bf16.gmra.mrb[24].mxu1 %v3124_v12  ;;  %v3221_v12 = vld [vmem:[%s3870_s0 + $0x1a8] ss:$40 sps:$4 sm:$0xff]  }
  0x84   :  { %1836 = vmatmul.mubr.bf16.gmra.mrb[24].mxu0 %v3128_v14  ;;  %1655 = vmatpush1.bf16.msra.mxu1 %v3125_v13  ;;  %v3222_v13 = vld [vmem:[#allocation3 + $0x4a0] ss:$8 sps:$4 sm:$0xff]   ;;  %v3227_v14 = vld [vmem:[#allocation3 + $0x4b4] ss:$8 sps:$4 sm:$0xff]  }
  0x85   :  { %1881 = vmatpush1.bf16.msra.mxu0 %v3129_v15  ;;  %1656 = vmatprep.subr.bf16.mxu1 %v3134_v16  ;;  %v3228_v15 = vld [vmem:[%s3870_s0 + $0x1ec] ss:$40 sps:$4 sm:$0xff]   ;;  %v3230_v16 = vld [vmem:[%s3870_s0 + $0x1fc] ss:$40 sps:$4 sm:$0xff]  }
  0x86   :  { %1882 = vmatprep.subr.bf16.mxu0 %v3137_v17  ;;  %1619 = vmatprep.mubr.bf16.mxu1 %v3138_v18  ;;  %v3225_v17 = vld [vmem:[#allocation3 + $0x4b0] ss:$8 sps:$4 sm:$0xff]   ;;  %v3236_v18 = vld [vmem:[#allocation3 + $0x4c4] ss:$8 sps:$4 sm:$0xff]  }
  0x87   :  { %1845 = vmatprep.mubr.bf16.mxu0 %v3140_v19  ;;  %v3232_v19 = vld [vmem:[%s3870_s0 + $0x1e8] ss:$40 sps:$4 sm:$0xff]  }
  0x88   :  { %1657 = vmatpush1.bf16.msra.mxu1 %v3132_v20  ;;  %v3233_v20 = vld [vmem:[%s3870_s0 + $0x1f8] ss:$40 sps:$4 sm:$0xff]  }
  0x89   :  { %1883 = vmatpush1.bf16.msra.mxu0 %v3135_v21  ;;  %1658 = vmatprep.subr.bf16.mxu1 %v3145_v22  ;;  %v3234_v21 = vld [vmem:[#allocation3 + $0x4c0] ss:$8 sps:$4 sm:$0xff]   ;;  %v3239_v22 = vld [vmem:[#allocation3 + $0x4d4] ss:$8 sps:$4 sm:$0xff]  }
  0x8a   :  { %1884 = vmatprep.subr.bf16.mxu0 %v3149_v23  ;;  %v3240_v23 = vld [vmem:[%s3870_s0 + $0x23c] ss:$40 sps:$4 sm:$0xff]  }
  0x8b   :  { %1620 = vmatmul.mubr.bf16.gmra.mrb[28].mxu1 %v3142_v24  ;;  %v3242_v24 = vld [vmem:[%s3870_s0 + $0x24c] ss:$40 sps:$4 sm:$0xff]  }
  0x8c   :  { %1846 = vmatmul.mubr.bf16.gmra.mrb[28].mxu0 %v3146_v26  ;;  %1659 = vmatpush1.bf16.msra.mxu1 %v3143_v25  ;;  %v3237_v25 = vld [vmem:[#allocation3 + $0x4d0] ss:$8 sps:$4 sm:$0xff]   ;;  %v3248_v26 = vld [vmem:[#allocation3 + $0x4e4] ss:$8 sps:$4 sm:$0xff]  }
  0x8d   :  { %1885 = vmatpush1.bf16.msra.mxu0 %v3147_v27  ;;  %1660 = vmatprep.subr.bf16.mxu1 %v3152_v28  ;;  %v3244_v27 = vld [vmem:[%s3870_s0 + $0x238] ss:$40 sps:$4 sm:$0xff]   ;;  %v3245_v28 = vld [vmem:[%s3870_s0 + $0x248] ss:$40 sps:$4 sm:$0xff]  }
  0x8e   :  { %1886 = vmatprep.subr.bf16.mxu0 %v3155_v29  ;;  %1662 = vmatprep.mubr.bf16.mxu1 %v3158_v30  ;;  %v3246_v29 = vld [vmem:[#allocation3 + $0x4e0] ss:$8 sps:$4 sm:$0xff]   ;;  %v3251_v30 = vld [vmem:[#allocation3 + $0x4f4] ss:$8 sps:$4 sm:$0xff]  }
  0x8f   :  { %1888 = vmatprep.mubr.bf16.mxu0 %v3161_v31  ;;  %v3254_v31 = vld [vmem:[%s3870_s0 + $0x24] ss:$40 sps:$4 sm:$0xff]  }
  0x90   :  { %1661 = vmatpush1.bf16.msra.mxu1 %v3150_v32  ;;  %v3257_v32 = vld [vmem:[%s3870_s0 + $0x164] ss:$40 sps:$4 sm:$0xff]  }
  0x91   :  { %1887 = vmatpush1.bf16.msra.mxu0 %v3153_v33  ;;  %2721 = vmatprep.subr.bf16.mxu1 %v3164_v34  ;;  %v3249_v33 = vld [vmem:[#allocation3 + $0x4f0] ss:$8 sps:$4 sm:$0xff]  }
  0x92   :  { %1969 = vmatprep.subr.bf16.mxu0 %v3164_v34  ;;  %v3252_v34 = vld [vmem:[%s3870_s0 + $0x20] ss:$40 sps:$4 sm:$0xff]  }
  0x93   :  { %1663 = vmatmul.mubr.bf16.vlgmr.msra.gmra.mrb[0].mxu1 %v3156_v35  ;;  %v3255_v35 = vld [vmem:[%s3870_s0 + $0x160] ss:$40 sps:$4 sm:$0xff]  }
  0x94   :  { %1889 = vmatmul.mubr.bf16.vlgmr.msra.gmra.mrb[0].mxu0 %v3159_v36  ;;  %2737 = vmatpush1.bf16.msra.mxu1 %v3162_v37  ;;  %v3258_v36 = vld [vmem:[%s3870_s0 + $0x74] ss:$40 sps:$4 sm:$0xff]  }
  0x95   :  { %1970 = vmatpush1.bf16.msra.mxu0 %v3162_v37  ;;  %2722 = vmatprep.subr.bf16.mxu1 %v3167_v38  ;;  %v3260_v37 = vld [vmem:[%s3870_s0 + $0x1b4] ss:$40 sps:$4 sm:$0xff]  }
  0x96   :  { %1971 = vmatprep.subr.bf16.mxu0 %v3167_v38  ;;  %1672 = vmatprep.mubr.bf16.mxu1 %v3168_v39  ;;  %v3262_v38 = vld [vmem:[%s3870_s0 + $0x70] ss:$40 sps:$4 sm:$0xff]  }
  0x97   :  { %1898 = vmatprep.mubr.bf16.mxu0 %v3170_v40  ;;  %v3263_v39 = vld [vmem:[%s3870_s0 + $0x1b0] ss:$40 sps:$4 sm:$0xff]   ;;  %v3264_v40 = vld [vmem:[%s3870_s0 + $0xc4] ss:$40 sps:$4 sm:$0xff]  }
  0x98   :  { %2738 = vmatpush1.bf16.msra.mxu1 %v3165_v41 }
  0x99   :  { %1972 = vmatpush1.bf16.msra.mxu0 %v3165_v41  ;;  %2723 = vmatprep.subr.bf16.mxu1 %v3176_v42  ;;  %v3266_v41 = vld [vmem:[%s3870_s0 + $0x204] ss:$40 sps:$4 sm:$0xff]  }
  0x9a   :  { %1973 = vmatprep.subr.bf16.mxu0 %v3176_v42  ;;  %v3268_v42 = vld [vmem:[%s3870_s0 + $0xc0] ss:$40 sps:$4 sm:$0xff]  }
  0x9b   :  { %1673 = vmatmul.mubr.bf16.gmra.mrb[4].mxu1 %v3172_v43  ;;  %v3269_v43 = vld [vmem:[%s3870_s0 + $0x200] ss:$40 sps:$4 sm:$0xff]  }
  0x9c   :  { %1899 = vmatmul.mubr.bf16.gmra.mrb[4].mxu0 %v3173_v44  ;;  %2739 = vmatpush1.bf16.msra.mxu1 %v3174_v45  ;;  %v3270_v44 = vld [vmem:[%s3870_s0 + $0x114] ss:$40 sps:$4 sm:$0xff]  }
  0x9d   :  { %1974 = vmatpush1.bf16.msra.mxu0 %v3174_v45  ;;  %2724 = vmatprep.subr.bf16.mxu1 %v3179_v46  ;;  %v3272_v45 = vld [vmem:[%s3870_s0 + $0x254] ss:$40 sps:$4 sm:$0xff]  }
  0x9e   :  { %1975 = vmatprep.subr.bf16.mxu0 %v3179_v46  ;;  %1682 = vmatprep.mubr.bf16.mxu1 %v3180_v47  ;;  %v3274_v46 = vld [vmem:[%s3870_s0 + $0x110] ss:$40 sps:$4 sm:$0xff]  }
  0x9f   :  { %1908 = vmatprep.mubr.bf16.mxu0 %v3182_v48  ;;  %v3275_v47 = vld [vmem:[%s3870_s0 + $0x250] ss:$40 sps:$4 sm:$0xff]   ;;  %v2308_v48 = vld [vmem:[%s3873_s3 + $0x80] sm:$0xff] }
  0xa0   :  { %2740 = vmatpush1.bf16.msra.mxu1 %v3177_v49 }
  0xa1   :  { %1976 = vmatpush1.bf16.msra.mxu0 %v3177_v49  ;;  %2725 = vmatprep.subr.bf16.mxu1 %v3188_v50  ;;  %v2309_v49 = vld [vmem:[%s3873_s3 + $0x88] sm:$0xff] }
  0xa2   :  { %1977 = vmatprep.subr.bf16.mxu0 %v3188_v50  ;;  %v2689_v50 = vpack.c.bf16 %v2309_v49, %v2308_v48 }
  0xa3   :  { %1683 = vmatmul.mubr.bf16.gmra.mrb[8].mxu1 %v3184_v51  ;;  %v2292_v51 = vld [vmem:[%s3873_s3] sm:$0xff] }
  0xa4   :  { %1909 = vmatmul.mubr.bf16.gmra.mrb[8].mxu0 %v3185_v52  ;;  %2741 = vmatpush1.bf16.msra.mxu1 %v3186_v53  ;;  %v2293_v52 = vld [vmem:[%s3873_s3 + $0x8] sm:$0xff] }
  0xa5   :  { %1978 = vmatpush1.bf16.msra.mxu0 %v3186_v53  ;;  %2726 = vmatprep.subr.bf16.mxu1 %v3191_v54  ;;  %v2691_v53 = vpack.c.bf16 %v2293_v52, %v2292_v51  ;;  %v305_v51 = vld [vmem:[%s3872_s2] sm:$0x3] }
  0xa6   :  { %1979 = vmatprep.subr.bf16.mxu0 %v3191_v54  ;;  %1692 = vmatprep.mubr.bf16.mxu1 %v3192_v55  ;;  %v2310_v54 = vld [vmem:[%s3873_s3 + $0x90] sm:$0xff]  ;;  %v2311_v55 = vld [vmem:[%s3873_s3 + $0x98] sm:$0xff] }
  0xa7   :  { %1918 = vmatprep.mubr.bf16.mxu0 %v3194_v56  ;;  %v2693_v56 = vpack.c.bf16 %v2311_v55, %v2310_v54 }
  0xa8   :  { %2742 = vmatpush1.bf16.msra.mxu1 %v3189_v57 }
  0xa9   :  { %1980 = vmatpush1.bf16.msra.mxu0 %v3189_v57  ;;  %2727 = vmatprep.subr.bf16.mxu1 %v3200_v58  ;;  %v2294_v57 = vld [vmem:[%s3873_s3 + $0x10] sm:$0xff] }
  0xaa   :  { %1981 = vmatprep.subr.bf16.mxu0 %v3200_v58  ;;  %v2295_v58 = vld [vmem:[%s3873_s3 + $0x18] sm:$0xff] }
  0xab   :  { %1693 = vmatmul.mubr.bf16.gmra.mrb[12].mxu1 %v3196_v59  ;;  %v2695_v59 = vpack.c.bf16 %v2295_v58, %v2294_v57 }
  0xac   :  { %1919 = vmatmul.mubr.bf16.gmra.mrb[12].mxu0 %v3197_v60  ;;  %2743 = vmatpush1.bf16.msra.mxu1 %v3198_v61  ;;  %v2312_v60 = vld [vmem:[%s3873_s3 + $0xa0] sm:$0xff] }
  0xad   :  { %1982 = vmatpush1.bf16.msra.mxu0 %v3198_v61  ;;  %2728 = vmatprep.subr.bf16.mxu1 %v3203_v62  ;;  %v2313_v61 = vld [vmem:[%s3873_s3 + $0xa8] sm:$0xff] }
  0xae   :  { %1983 = vmatprep.subr.bf16.mxu0 %v3203_v62  ;;  %1702 = vmatprep.mubr.bf16.mxu1 %v3204_v63  ;;  %v2697_v62 = vpack.c.bf16 %v2313_v61, %v2312_v60  ;;  %v2296_v63 = vld [vmem:[%s3873_s3 + $0x20] sm:$0xff] }
  0xaf   :  { %1928 = vmatprep.mubr.bf16.mxu0 %v3206_v0  ;;  %v2297_v0 = vld [vmem:[%s3873_s3 + $0x28] sm:$0xff] }
  0xb0   :  { %2744 = vmatpush1.bf16.msra.mxu1 %v3201_v1 }
  0xb1   :  { %1984 = vmatpush1.bf16.msra.mxu0 %v3201_v1  ;;  %2729 = vmatprep.subr.bf16.mxu1 %v3212_v2  ;;  %v2699_v1 = vpack.c.bf16 %v2297_v0, %v2296_v63 }
  0xb2   :  { %1985 = vmatprep.subr.bf16.mxu0 %v3212_v2  ;;  %v2314_v2 = vld [vmem:[%s3873_s3 + $0xb0] sm:$0xff] }
  0xb3   :  { %1703 = vmatmul.mubr.bf16.gmra.mrb[16].mxu1 %v3208_v3  ;;  %v2315_v3 = vld [vmem:[%s3873_s3 + $0xb8] sm:$0xff] }
  0xb4   :  { %1929 = vmatmul.mubr.bf16.gmra.mrb[16].mxu0 %v3209_v4  ;;  %2745 = vmatpush1.bf16.msra.mxu1 %v3210_v5  ;;  %v2701_v4 = vpack.c.bf16 %v2315_v3, %v2314_v2 }
  0xb5   :  { %1986 = vmatpush1.bf16.msra.mxu0 %v3210_v5  ;;  %2730 = vmatprep.subr.bf16.mxu1 %v3215_v6  ;;  %v2298_v5 = vld [vmem:[%s3873_s3 + $0x30] sm:$0xff] }
  0xb6   :  { %1987 = vmatprep.subr.bf16.mxu0 %v3215_v6  ;;  %1712 = vmatprep.mubr.bf16.mxu1 %v3216_v7  ;;  %v2299_v6 = vld [vmem:[%s3873_s3 + $0x38] sm:$0xff] }
  0xb7   :  { %1938 = vmatprep.mubr.bf16.mxu0 %v3218_v8  ;;  %v2703_v7 = vpack.c.bf16 %v2299_v6, %v2298_v5  ;;  %v2316_v8 = vld [vmem:[%s3873_s3 + $0xc0] sm:$0xff] }
  0xb8   :  { %2746 = vmatpush1.bf16.msra.mxu1 %v3213_v9 }
  0xb9   :  { %1988 = vmatpush1.bf16.msra.mxu0 %v3213_v9  ;;  %2731 = vmatprep.subr.bf16.mxu1 %v3224_v10  ;;  %v2317_v9 = vld [vmem:[%s3873_s3 + $0xc8] sm:$0xff] }
  0xba   :  { %1989 = vmatprep.subr.bf16.mxu0 %v3224_v10  ;;  %v2705_v10 = vpack.c.bf16 %v2317_v9, %v2316_v8 }
  0xbb   :  { %1713 = vmatmul.mubr.bf16.gmra.mrb[20].mxu1 %v3220_v11  ;;  %v2300_v11 = vld [vmem:[%s3873_s3 + $0x40] sm:$0xff] }
  0xbc   :  { %1939 = vmatmul.mubr.bf16.gmra.mrb[20].mxu0 %v3221_v12  ;;  %2747 = vmatpush1.bf16.msra.mxu1 %v3222_v13  ;;  %v2301_v12 = vld [vmem:[%s3873_s3 + $0x48] sm:$0xff] }
  0xbd   :  { %1990 = vmatpush1.bf16.msra.mxu0 %v3222_v13  ;;  %2732 = vmatprep.subr.bf16.mxu1 %v3227_v14  ;;  %v2707_v13 = vpack.c.bf16 %v2301_v12, %v2300_v11 }
  0xbe   :  { %1991 = vmatprep.subr.bf16.mxu0 %v3227_v14  ;;  %1722 = vmatprep.mubr.bf16.mxu1 %v3228_v15  ;;  %v2318_v14 = vld [vmem:[%s3873_s3 + $0xd0] sm:$0xff]  ;;  %v2319_v15 = vld [vmem:[%s3873_s3 + $0xd8] sm:$0xff] }
  0xbf   :  { %1948 = vmatprep.mubr.bf16.mxu0 %v3230_v16  ;;  %v2709_v16 = vpack.c.bf16 %v2319_v15, %v2318_v14 }
  0xc0   :  { %2748 = vmatpush1.bf16.msra.mxu1 %v3225_v17 }
  0xc1   :  { %1992 = vmatpush1.bf16.msra.mxu0 %v3225_v17  ;;  %2733 = vmatprep.subr.bf16.mxu1 %v3236_v18  ;;  %v2302_v17 = vld [vmem:[%s3873_s3 + $0x50] sm:$0xff] }
  0xc2   :  { %1993 = vmatprep.subr.bf16.mxu0 %v3236_v18  ;;  %v2303_v18 = vld [vmem:[%s3873_s3 + $0x58] sm:$0xff] }
  0xc3   :  { %1723 = vmatmul.mubr.bf16.gmra.mrb[24].mxu1 %v3232_v19  ;;  %v2711_v19 = vpack.c.bf16 %v2303_v18, %v2302_v17 }
  0xc4   :  { %1949 = vmatmul.mubr.bf16.gmra.mrb[24].mxu0 %v3233_v20  ;;  %2749 = vmatpush1.bf16.msra.mxu1 %v3234_v21  ;;  %v2320_v20 = vld [vmem:[%s3873_s3 + $0xe0] sm:$0xff] }
  0xc5   :  { %1994 = vmatpush1.bf16.msra.mxu0 %v3234_v21  ;;  %2734 = vmatprep.subr.bf16.mxu1 %v3239_v22  ;;  %v2321_v21 = vld [vmem:[%s3873_s3 + $0xe8] sm:$0xff] }
  0xc6   :  { %1995 = vmatprep.subr.bf16.mxu0 %v3239_v22  ;;  %1732 = vmatprep.mubr.bf16.mxu1 %v3240_v23  ;;  %v2713_v22 = vpack.c.bf16 %v2321_v21, %v2320_v20  ;;  %v2304_v23 = vld [vmem:[%s3873_s3 + $0x60] sm:$0xff] }
  0xc7   :  { %1958 = vmatprep.mubr.bf16.mxu0 %v3242_v24  ;;  %v2305_v24 = vld [vmem:[%s3873_s3 + $0x68] sm:$0xff] }
  0xc8   :  { %2750 = vmatpush1.bf16.msra.mxu1 %v3237_v25 }
  0xc9   :  { %1996 = vmatpush1.bf16.msra.mxu0 %v3237_v25  ;;  %2735 = vmatprep.subr.bf16.mxu1 %v3248_v26  ;;  %v2715_v25 = vpack.c.bf16 %v2305_v24, %v2304_v23 }
  0xca   :  { %1997 = vmatprep.subr.bf16.mxu0 %v3248_v26  ;;  %v2322_v26 = vld [vmem:[%s3873_s3 + $0xf0] sm:$0xff] }
  0xcb   :  { %1733 = vmatmul.mubr.bf16.gmra.mrb[28].mxu1 %v3244_v27  ;;  %v2323_v27 = vld [vmem:[%s3873_s3 + $0xf8] sm:$0xff] }
  0xcc   :  { %1959 = vmatmul.mubr.bf16.gmra.mrb[28].mxu0 %v3245_v28  ;;  %2751 = vmatpush1.bf16.msra.mxu1 %v3246_v29  ;;  %v2306_v28 = vld [vmem:[%s3873_s3 + $0x70] sm:$0xff] }
  0xcd   :  { %1998 = vmatpush1.bf16.msra.mxu0 %v3246_v29  ;;  %2736 = vmatprep.subr.bf16.mxu1 %v3251_v30  ;;  %v2717_v29 = vpack.c.bf16 %v2323_v27, %v2322_v26 }
  0xce   :  { %1999 = vmatprep.subr.bf16.mxu0 %v3251_v30  ;;  %2001 = vmatprep.mubr.bf16.mxu0 %v3254_v31  ;;  %v2307_v30 = vld [vmem:[%s3873_s3 + $0x78] sm:$0xff] }
  0xcf   :  { %2041 = vmatprep.mubr.bf16.mxu1 %v3257_v32  ;;  %v2719_v31 = vpack.c.bf16 %v2307_v30, %v2306_v28 }
  0xd0   :  { %2752 = vmatpush1.bf16.msra.mxu1 %v3249_v33 }
  0xd1   :  { %2000 = vmatpush1.bf16.msra.mxu0 %v3249_v33  ;;  %2690 = vmatprep.subr.bf16.mxu1 %v2689_v50 }
  0xd3   :  { %2042 = vmatmul.mubr.bf16.vlgmr.msra.gmra.mrb[32].mxu1 %v3255_v35 }
  0xd4   :  { %2002 = vmatmul.mubr.bf16.vlgmr.msra.gmra.mrb[0].mxu0 %v3252_v34  ;;  %2051 = vmatprep.mubr.bf16.mxu1 %v3260_v37 }
  0xd5   :  { %2011 = vmatprep.mubr.bf16.mxu0 %v3258_v36  ;;  %2692 = vmatpush3.bf16.msra.mxu1 %v2691_v53 }
  0xd6   :  { %2694 = vmatprep.subr.bf16.mxu1 %v2693_v56 }
  0xd9   :  { %2696 = vmatpush3.bf16.msra.mxu1 %v2695_v59 }
  0xda   :  { %2698 = vmatprep.subr.bf16.mxu1 %v2697_v62 }
  0xdb   :  { %2052 = vmatmul.mubr.bf16.gmra.mrb[36].mxu1 %v3263_v39 }
  0xdc   :  { %2012 = vmatmul.mubr.bf16.gmra.mrb[4].mxu0 %v3262_v38  ;;  %2061 = vmatprep.mubr.bf16.mxu1 %v3266_v41 }
  0xdd   :  { %2021 = vmatprep.mubr.bf16.mxu0 %v3264_v40  ;;  %2700 = vmatpush3.bf16.msra.mxu1 %v2699_v1 }
  0xde   :  { %2702 = vmatprep.subr.bf16.mxu1 %v2701_v4 }
  0xe1   :  { %2704 = vmatpush3.bf16.msra.mxu1 %v2703_v7 }
  0xe2   :  { %2706 = vmatprep.subr.bf16.mxu1 %v2705_v10 }
  0xe3   :  { %2062 = vmatmul.mubr.bf16.gmra.mrb[40].mxu1 %v3269_v43  ;;  %v307_v43 = vlaneseq }
  0xe4   :  { %2022 = vmatmul.mubr.bf16.gmra.mrb[8].mxu0 %v3268_v42  ;;  %2071 = vmatprep.mubr.bf16.mxu1 %v3272_v45 }
  0xe5   :  { %2031 = vmatprep.mubr.bf16.mxu0 %v3270_v44  ;;  %2708 = vmatpush3.bf16.msra.mxu1 %v2707_v13  ;;  %v3705_v45 = vshrl.u32 %v307_v43, 7 }
  0xe6   :  { %2710 = vmatprep.subr.bf16.mxu1 %v2709_v16 }
  0xe7   :  { %v309_v49 = vsub.s32 0, %v3705_v45  ;;  %v313_v52 = vsub.s32 1, %v3705_v45 }
  0xe9   :  { %2712 = vmatpush3.bf16.msra.mxu1 %v2711_v19  ;;  %v3722_v53 = vrot.slane %v305_v51, %v309_v49  ;;  %v3726_v54 = vrot.slane %v305_v51, %v313_v52 }
  0xea   :  { %2714 = vmatprep.subr.bf16.mxu1 %v2713_v22 }
  0xeb   :  { %2072 = vmatmul.mubr.bf16.gmra.mrb[44].mxu1 %v3275_v47 }
  0xec   :  { %2032 = vmatmul.mubr.bf16.gmra.mrb[12].mxu0 %v3274_v46 }
  0xed   :  { %2716 = vmatpush3.bf16.msra.mxu1 %v2715_v25 }
  0xee   :  { %2718 = vmatprep.subr.bf16.mxu1 %v2717_v29 }
  0xf1   :  { %2720 = vmatpush3.bf16.msra.mxu1 %v2719_v31 }
 0x166   :  { %v3681_v32 = vpop.f32.mrb[0].mxu1 }
 0x167   :  { %v3683_v33 = vpop.f32.mrb[1].mxu1 }
 0x168   :  { %v3685_v34 = vpop.f32.mrb[2].mxu1 }
 0x169   :  { %v3687_v35 = vpop.f32.mrb[3].mxu1 }
 0x16e   :  { %v3689_v36 = vpop.f32.mrb[4].mxu1 }
 0x16f   :  { %v3691_v37 = vpop.f32.mrb[5].mxu1 }
 0x170   :  { %v3693_v38 = vpop.f32.mrb[6].mxu1 }
 0x171   :  { %v3695_v39 = vpop.f32.mrb[7].mxu1 }
 0x176   :  { %v3697_v40 = vpop.f32.mrb[8].mxu1 }
 0x177   :  { %v3699_v41 = vpop.f32.mrb[9].mxu1 }
 0x178   :  { %v3701_v42 = vpop.f32.mrb[10].mxu1 }
 0x179   :  { %v3703_v44 = vpop.f32.mrb[11].mxu1 }
 0x17e   :  { %v3707_v46 = vpop.f32.mrb[12].mxu1 }
 0x17f   :  { %v3709_v47 = vpop.f32.mrb[13].mxu1 }
 0x180   :  { %v3711_v48 = vpop.f32.mrb[14].mxu1 }
 0x181   :  { %v3714_v50 = vpop.f32.mrb[15].mxu1 }
 0x186   :  { %v1704_v55 = vpop.f32.mrb[16].mxu1 }
 0x187   :  { %v1930_v56 = vpop.f32.mrb[16].mxu0  ;;  %v2785_v57 = vadd.f32 %v1704_v55, %v3722_v53  ;;  %v1706_v58 = vpop.f32.mrb[17].mxu1 }
 0x188   :  { %v1932_v59 = vpop.f32.mrb[17].mxu0  ;;  %v2788_v60 = vadd.f32 %v1706_v58, %v3726_v54  ;;  %v1708_v61 = vpop.f32.mrb[18].mxu1 }
 0x189   :  { %v1934_v62 = vpop.f32.mrb[18].mxu0  ;;  %v2786_v63 = vadd.f32 %v2785_v57, %v1930_v56  ;;  %v2791_v0 = vadd.f32 %v1708_v61, %v3722_v53  ;;  %v1710_v1 = vpop.f32.mrb[19].mxu1 }
 0x18a   :  { %v1936_v2 = vpop.f32.mrb[19].mxu0  ;;  %v3731_v3 = vadd.f32 %v2788_v60, %v1932_v59  ;;  %v2794_v4 = vadd.f32 %v1710_v1, %v3726_v54 }
 0x18b   :  { %v3734_v5 = vadd.f32 %v2791_v0, %v1934_v62 }
 0x18c   :  { %v3736_v6 = vadd.f32 %v2794_v4, %v1936_v2 }
 0x18e   :  { %v1714_v7 = vpop.f32.mrb[20].mxu1 }
 0x18f   :  { %v1940_v8 = vpop.f32.mrb[20].mxu0  ;;  %v2797_v9 = vadd.f32 %v1714_v7, %v3722_v53  ;;  %v1716_v10 = vpop.f32.mrb[21].mxu1 }
 0x190   :  { %v1942_v11 = vpop.f32.mrb[21].mxu0  ;;  %v2800_v12 = vadd.f32 %v1716_v10, %v3726_v54  ;;  %v1718_v13 = vpop.f32.mrb[22].mxu1 }
 0x191   :  { %v1944_v14 = vpop.f32.mrb[22].mxu0  ;;  %v3740_v15 = vadd.f32 %v2797_v9, %v1940_v8  ;;  %v2803_v16 = vadd.f32 %v1718_v13, %v3722_v53  ;;  %v1720_v17 = vpop.f32.mrb[23].mxu1 }
 0x192   :  { %v1946_v18 = vpop.f32.mrb[23].mxu0  ;;  %v3743_v19 = vadd.f32 %v2800_v12, %v1942_v11  ;;  %v2806_v20 = vadd.f32 %v1720_v17, %v3726_v54  ;;  %v2753_v17 = vadd.f32 %v3681_v32, %v3722_v53 }
 0x193   :  { %v3746_v21 = vadd.f32 %v2803_v16, %v1944_v14 }
 0x194   :  { %v3748_v22 = vadd.f32 %v2806_v20, %v1946_v18  ;;  %v2755_v18 = vadd.f32 %v3683_v33, %v3726_v54 }
 0x196   :  { %v1724_v23 = vpop.f32.mrb[24].mxu1 }
 0x197   :  { %v1950_v24 = vpop.f32.mrb[24].mxu0  ;;  %v2809_v25 = vadd.f32 %v1724_v23, %v3722_v53  ;;  %v1726_v26 = vpop.f32.mrb[25].mxu1 }
 0x198   :  { %v1952_v27 = vpop.f32.mrb[25].mxu0  ;;  %v2812_v28 = vadd.f32 %v1726_v26, %v3726_v54  ;;  %v1728_v29 = vpop.f32.mrb[26].mxu1 }
 0x199   :  { %v1954_v30 = vpop.f32.mrb[26].mxu0  ;;  %v3752_v31 = vadd.f32 %v2809_v25, %v1950_v24  ;;  %v2815_v43 = vadd.f32 %v1728_v29, %v3722_v53  ;;  %v1730_v51 = vpop.f32.mrb[27].mxu1  ;;  %v2757_v24 = vadd.f32 %v3685_v34, %v3722_v53  ;;  %v2759_v29 = vadd.f32 %v3687_v35, %v3726_v54 }
 0x19a   :  { %v1956_v55 = vpop.f32.mrb[27].mxu0  ;;  %v3755_v56 = vadd.f32 %v2812_v28, %v1952_v27  ;;  %v2818_v57 = vadd.f32 %v1730_v51, %v3726_v54 }
 0x19b   :  { %v3758_v58 = vadd.f32 %v2815_v43, %v1954_v30 }
 0x19c   :  { %v3760_v59 = vadd.f32 %v2818_v57, %v1956_v55 }
 0x19e   :  { %v1734_v60 = vpop.f32.mrb[28].mxu1 }
 0x19f   :  { %v1960_v61 = vpop.f32.mrb[28].mxu0  ;;  %v2821_v62 = vadd.f32 %v1734_v60, %v3722_v53  ;;  %v1736_v0 = vpop.f32.mrb[29].mxu1 }
 0x1a0   :  { %v1962_v1 = vpop.f32.mrb[29].mxu0  ;;  %v2824_v2 = vadd.f32 %v1736_v0, %v3726_v54  ;;  %v1738_v4 = vpop.f32.mrb[30].mxu1 }
 0x1a1   :  { %v1964_v7 = vpop.f32.mrb[30].mxu0  ;;  %v3764_v8 = vadd.f32 %v2821_v62, %v1960_v61  ;;  %v2827_v9 = vadd.f32 %v1738_v4, %v3722_v53  ;;  %v1740_v10 = vpop.f32.mrb[31].mxu1 }
 0x1a2   :  { %v1966_v11 = vpop.f32.mrb[31].mxu0  ;;  %v3767_v12 = vadd.f32 %v2824_v2, %v1962_v1  ;;  %v2830_v13 = vadd.f32 %v1740_v10, %v3726_v54 }
 0x1a3   :  { %v3770_v14 = vadd.f32 %v2827_v9, %v1964_v7 }
 0x1a4   :  { %v3772_v16 = vadd.f32 %v2830_v13, %v1966_v11 }
 0x1a6   :  { %v2043_v23 = vpop.f32.mrb[32].mxu1 }
 0x1a7   :  { %v2003_v20 = vpop.f32.mrb[0].mxu0  ;;  %v2787_v26 = vadd.f32 %v2786_v63, %v2043_v23  ;;  %v2045_v28 = vpop.f32.mrb[33].mxu1 }
 0x1a8   :  { %v2754_v25 = vadd.f32 %v2753_v17, %v2003_v20  ;;  %v2005_v27 = vpop.f32.mrb[1].mxu0  ;;  %v2790_v43 = vadd.f32 %v3731_v3, %v2045_v28  ;;  %v2047_v32 = vpop.f32.mrb[34].mxu1  ;;  %v2761_v3 = vadd.f32 %v3689_v36, %v3722_v53 }
 0x1a9   :  { %v2756_v30 = vadd.f32 %v2755_v18, %v2005_v27  ;;  %v2007_v51 = vpop.f32.mrb[2].mxu0  ;;  %v2793_v33 = vadd.f32 %v3734_v5, %v2047_v32  ;;  %v2049_v60 = vpop.f32.mrb[35].mxu1  ;;  %v2098_v63 = vmax.f32 %v2787_v26, 0.0  ;;  %v2763_v5 = vadd.f32 %v3691_v37, %v3726_v54 }
 0x1aa   :  { %v2758_v55 = vadd.f32 %v2757_v24, %v2007_v51  ;;  %v2009_v57 = vpop.f32.mrb[3].mxu0  ;;  %v2796_v34 = vadd.f32 %v3736_v6, %v2049_v60  ;;  %v2082_v62 = vmax.f32 %v2754_v25, 0.0  ;;  %v2099_v4 = vmax.f32 %v2790_v43, 0.0 }
 0x1ab   :  { %v2760_v61 = vadd.f32 %v2759_v29, %v2009_v57  ;;  %v2100_v1 = vmax.f32 %v2793_v33, 0.0  ;;  %v2083_v2 = vmax.f32 %v2756_v30, 0.0  ;;  %v2765_v37 = vadd.f32 %v3693_v38, %v3722_v53 }
 0x1ac   :  { %v2084_v0 = vmax.f32 %v2758_v55, 0.0  ;;  %v2101_v7 = vmax.f32 %v2796_v34, 0.0  ;;  %v2767_v32 = vadd.f32 %v3695_v39, %v3726_v54 }
 0x1ad   :  { %v2085_v35 = vmax.f32 %v2760_v61, 0.0  ;;  %v2172_v10 = vadd.f32 %v2100_v1, %v2098_v63 }
 0x1ae   :  { %v2116_v9 = vadd.f32 %v2084_v0, %v2082_v62  ;;  %v3789_v13 = vadd.f32 %v2101_v7, %v2099_v4  ;;  %v2053_v17 = vpop.f32.mrb[36].mxu1 }
 0x1af   :  { %v2123_v11 = vadd.f32 %v2085_v35, %v2083_v2  ;;  %v2013_v6 = vpop.f32.mrb[4].mxu0  ;;  %v2799_v23 = vadd.f32 %v3740_v15, %v2053_v17  ;;  %v2055_v25 = vpop.f32.mrb[37].mxu1  ;;  %v2173_v15 = vrot.slane %v2172_v10, 4 }
 0x1b0   :  { %v2117_v18 = vrot.slane %v2116_v9, 4  ;;  %v2762_v20 = vadd.f32 %v2761_v3, %v2013_v6  ;;  %v2015_v24 = vpop.f32.mrb[5].mxu0  ;;  %v2802_v36 = vadd.f32 %v3743_v19, %v2055_v25  ;;  %v2057_v29 = vpop.f32.mrb[38].mxu1  ;;  %v2769_v6 = vadd.f32 %v3697_v40, %v3722_v53 }
 0x1b1   :  { %v2124_v26 = vrot.slane %v2123_v11, 4  ;;  %v2764_v27 = vadd.f32 %v2763_v5, %v2015_v24  ;;  %v2017_v28 = vpop.f32.mrb[6].mxu0  ;;  %v2059_v51 = vpop.f32.mrb[39].mxu1  ;;  %v2805_v60 = vadd.f32 %v3746_v21, %v2057_v29  ;;  %v2102_v34 = vmax.f32 %v2799_v23, 0.0 }
 0x1b2   :  { %v2118_v30 = vadd.f32 %v2117_v18, %v2116_v9  ;;  %v2019_v43 = vpop.f32.mrb[7].mxu0  ;;  %v2766_v57 = vadd.f32 %v2765_v37, %v2017_v28  ;;  %v2086_v61 = vmax.f32 %v2762_v20, 0.0  ;;  %v2808_v62 = vadd.f32 %v3748_v22, %v2059_v51 }
 0x1b3   :  { %v2125_v55 = vadd.f32 %v2124_v26, %v2123_v11  ;;  %v2768_v19 = vadd.f32 %v2767_v32, %v2019_v43  ;;  %v2087_v63 = vmax.f32 %v2764_v27, 0.0  ;;  %v2103_v0 = vmax.f32 %v2802_v36, 0.0 }
 0x1b4   :  { %v2119_v33 = vrot.slane %v2118_v30, 2  ;;  %v2088_v38 = vmax.f32 %v2766_v57, 0.0  ;;  %v2104_v1 = vmax.f32 %v2805_v60, 0.0  ;;  %v2105_v7 = vmax.f32 %v2808_v62, 0.0 }
 0x1b5   :  { %v2126_v4 = vrot.slane %v2125_v55, 2  ;;  %v2089_v35 = vmax.f32 %v2768_v19, 0.0  ;;  %v2771_v23 = vadd.f32 %v3699_v41, %v3726_v54  ;;  %v2773_v24 = vadd.f32 %v3701_v42, %v3722_v53 }
 0x1b6   :  { %v2120_v2 = vadd.f32 %v2119_v33, %v2118_v30  ;;  %v2063_v3 = vpop.f32.mrb[40].mxu1  ;;  %v2130_v9 = vadd.f32 %v2088_v38, %v2086_v61  ;;  %v3799_v5 = vadd.f32 %v2104_v1, %v2102_v34  ;;  %v3803_v22 = vadd.f32 %v2105_v7, %v2103_v0 }
 0x1b7   :  { %v2023_v39 = vpop.f32.mrb[8].mxu0  ;;  %v2065_v21 = vpop.f32.mrb[41].mxu1  ;;  %v2137_v17 = vadd.f32 %v2089_v35, %v2087_v63  ;;  %v2180_v25 = vrot.slane %v3789_v13, 4  ;;  %v3810_v29 = vadd.f32 %v2173_v15, %v2172_v10  ;;  %v2127_v40 = vadd.f32 %v2126_v4, %v2125_v55 }
 0x1b8   :  { %v2025_v11 = vpop.f32.mrb[9].mxu0  ;;  %v2067_v20 = vpop.f32.mrb[42].mxu1  ;;  %v2131_v26 = vrot.slane %v2130_v9, 4  ;;  %v2121_v28 = vrot.slane %v2120_v2, 1  ;;  %v2775_v30 = vadd.f32 %v3703_v44, %v3726_v54  ;;  %v2770_v51 = vadd.f32 %v2769_v6, %v2023_v39 }
 0x1b9   :  { %v2027_v18 = vpop.f32.mrb[10].mxu0  ;;  %v2069_v36 = vpop.f32.mrb[43].mxu1  ;;  %v2138_v37 = vrot.slane %v2137_v17, 4  ;;  %v2811_v41 = vadd.f32 %v3752_v31, %v2063_v3  ;;  %v2777_v42 = vadd.f32 %v3707_v46, %v3722_v53  ;;  %v2772_v33 = vadd.f32 %v2771_v23, %v2025_v11 }
 0x1ba   :  { %v2029_v27 = vpop.f32.mrb[11].mxu0  ;;  %v2132_v43 = vadd.f32 %v2131_v26, %v2130_v9  ;;  %v2814_v57 = vadd.f32 %v3755_v56, %v2065_v21  ;;  %v2779_v10 = vadd.f32 %v3709_v47, %v3726_v54  ;;  %v2781_v55 = vadd.f32 %v3711_v48, %v3722_v53 }
 0x1bb   :  { %v2139_v32 = vadd.f32 %v2138_v37, %v2137_v17  ;;  %v3823_v15 = vadd.f32 %v2180_v25, %v3789_v13  ;;  %v2122_v60 = vadd.f32 %v2121_v28, %v2120_v2  ;;  %v2175_v31 = vrot.slane %v3810_v29, 2 }
 0x1bc   :  { %v2133_v44 = vrot.slane %v2132_v43, 2  ;;  %v2128_v61 = vrot.slane %v2127_v40, 1  ;;  %v2090_v63 = vmax.f32 %v2770_v51, 0.0  ;;  %v2774_v56 = vadd.f32 %v2773_v24, %v2027_v18 }
 0x1bd   :  { %v2140_v34 = vrot.slane %v2139_v32, 2  ;;  %v2817_v0 = vadd.f32 %v3758_v58, %v2067_v20  ;;  %v2106_v48 = vmax.f32 %v2811_v41, 0.0  ;;  %v2776_v53 = vadd.f32 %v2775_v30, %v2029_v27 }
 0x1be   :  { %v2073_v19 = vpop.f32.mrb[44].mxu1  ;;  %v2134_v62 = vadd.f32 %v2133_v44, %v2132_v43  ;;  %v2820_v13 = vadd.f32 %v3760_v59, %v2069_v36  ;;  %v2091_v7 = vmax.f32 %v2772_v33, 0.0  ;;  %v2092_v39 = vmax.f32 %v2774_v56, 0.0 }
 0x1bf   :  { %v2033_v46 = vpop.f32.mrb[12].mxu0  ;;  %v2075_v38 = vpop.f32.mrb[45].mxu1  ;;  %v2141_v1 = vadd.f32 %v2140_v34, %v2139_v32  ;;  %v2108_v3 = vmax.f32 %v2817_v0, 0.0  ;;  %v2107_v6 = vmax.f32 %v2814_v57, 0.0  ;;  %v2093_v17 = vmax.f32 %v2776_v53, 0.0 }
 0x1c0   :  { %v2035_v47 = vpop.f32.mrb[13].mxu0  ;;  %v2077_v2 = vpop.f32.mrb[46].mxu1  ;;  %v2135_v35 = vrot.slane %v2134_v62, 1  ;;  %v2109_v18 = vmax.f32 %v2820_v13, 0.0  ;;  %v2187_v20 = vrot.slane %v3799_v5, 4  ;;  %v2144_v23 = vadd.f32 %v2092_v39, %v2090_v63 }
 0x1c1   :  { %v2037_v4 = vpop.f32.mrb[14].mxu0  ;;  %v2079_v11 = vpop.f32.mrb[47].mxu1  ;;  %v2142_v21 = vrot.slane %v2141_v1, 1  ;;  %v2200_v24 = vadd.f32 %v2108_v3, %v2106_v48  ;;  %v2129_v25 = vadd.f32 %v2128_v61, %v2127_v40  ;;  %v2151_v59 = vadd.f32 %v2093_v17, %v2091_v7 }
 0x1c2   :  { %v2039_v9 = vpop.f32.mrb[15].mxu0  ;;  %v2136_v58 = vadd.f32 %v2135_v35, %v2134_v62  ;;  %v2207_v27 = vadd.f32 %v2109_v18, %v2107_v6  ;;  %v2194_v28 = vrot.slane %v3803_v22, 4  ;;  %v2145_v37 = vrot.slane %v2144_v23, 4 }
 0x1c3   :  { %v2143_v26 = vadd.f32 %v2142_v21, %v2141_v1  ;;  %v2778_v30 = vadd.f32 %v2777_v42, %v2033_v46  ;;  %v2201_v51 = vrot.slane %v2200_v24, 4  ;;  %v2152_v41 = vrot.slane %v2151_v59, 4 }
 0x1c4   :  { %v2245_v36 = vsel %vm2244_vm0, %v2136_v58, %v2122_v60  ;;  %v2823_v32 = vadd.f32 %v3764_v8, %v2073_v19  ;;  %v2783_v33 = vadd.f32 %v3714_v50, %v3726_v54  ;;  %v2146_v40 = vadd.f32 %v2145_v37, %v2144_v23 }
 0x1c5   :  { %v2258_v43 = vsel %vm2244_vm0, %v2143_v26, %v2129_v25  ;;  %v2208_v57 = vrot.slane %v2207_v27, 4  ;;  %v2780_v44 = vadd.f32 %v2779_v10, %v2035_v47  ;;  %v3836_v61 = vadd.f32 %v2175_v31, %v3810_v29  ;;  %v2276_v25 = vld [vmem:[%s3872_s2] sm:$0x3] }
 0x1c6   :  { %v2182_v60 = vrot.slane %v3823_v15, 2  ;;  %v2153_v34 = vadd.f32 %v2152_v41, %v2151_v59  ;;  %v2826_v42 = vadd.f32 %v3767_v12, %v2075_v38  ;;  %v2188_v46 = vadd.f32 %v2187_v20, %v3799_v5 }
 0x1c7   :  { %v2195_v62 = vadd.f32 %v2194_v28, %v3803_v22  ;;  %v2147_v63 = vrot.slane %v2146_v40, 2  ;;  %v2782_v8 = vadd.f32 %v2781_v55, %v2037_v4  ;;  %v2202_v19 = vadd.f32 %v2201_v51, %v2200_v24 }
 0x1c8   :  { %v2154_v56 = vrot.slane %v2153_v34, 2  ;;  %v2094_v50 = vmax.f32 %v2778_v30, 0.0  ;;  %v2829_v54 = vadd.f32 %v3770_v14, %v2077_v2  ;;  %v2209_v0 = vadd.f32 %v2208_v57, %v2207_v27 }
 0x1c9   :  { %v2148_v10 = vadd.f32 %v2147_v63, %v2146_v40  ;;  %v2096_v29 = vmax.f32 %v2782_v8, 0.0  ;;  %v2784_v31 = vadd.f32 %v2783_v33, %v2039_v9  ;;  %v2110_v1 = vmax.f32 %v2823_v32, 0.0 }
 0x1ca   :  { %v2155_v47 = vadd.f32 %v2154_v56, %v2153_v34  ;;  %v2112_v48 = vmax.f32 %v2829_v54, 0.0  ;;  %v2832_v12 = vadd.f32 %v3772_v16, %v2079_v11  ;;  %v2095_v5 = vmax.f32 %v2780_v44, 0.0 }
 0x1cb   :  { %v2149_v38 = vrot.slane %v2148_v10, 1  ;;  %v2158_v53 = vadd.f32 %v2096_v29, %v2094_v50  ;;  %v2097_v22 = vmax.f32 %v2784_v31, 0.0  ;;  %v2111_v55 = vmax.f32 %v2826_v42, 0.0 }
 0x1cc   :  { %v2156_v13 = vrot.slane %v2155_v47, 1  ;;  %v2214_v4 = vadd.f32 %v2112_v48, %v2110_v1  ;;  %v2113_v35 = vmax.f32 %v2832_v12, 0.0  ;;  %v2189_v7 = vrot.slane %v2188_v46, 2 }
 0x1cd   :  { %v2150_v39 = vadd.f32 %v2149_v38, %v2148_v10  ;;  %v2159_v14 = vrot.slane %v2158_v53, 4  ;;  %v2165_v2 = vadd.f32 %v2097_v22, %v2095_v5  ;;  %v2203_v3 = vrot.slane %v2202_v19, 2 }
 0x1ce   :  { %v2157_v21 = vadd.f32 %v2156_v13, %v2155_v47  ;;  %v2215_v9 = vrot.slane %v2214_v4, 4  ;;  %v2221_v6 = vadd.f32 %v2113_v35, %v2111_v55  ;;  %v2196_v17 = vrot.slane %v2195_v62, 2 }
 0x1cf   :  { %v2247_v18 = vsel %vm2246_vm1, %v2150_v39, %v2245_v36  ;;  %v2160_v16 = vadd.f32 %v2159_v14, %v2158_v53  ;;  %v2166_v11 = vrot.slane %v2165_v2, 4  ;;  %v2210_v20 = vrot.slane %v2209_v0, 2 }
 0x1d0   :  { %v2259_v58 = vsel %vm2246_vm1, %v2157_v21, %v2258_v43  ;;  %v2216_v23 = vadd.f32 %v2215_v9, %v2214_v4  ;;  %v2222_v24 = vrot.slane %v2221_v6, 4  ;;  %v2190_v26 = vadd.f32 %v2189_v7, %v2188_v46 }
 0x1d1   :  { %v2161_v59 = vrot.slane %v2160_v16, 2  ;;  %v2167_v27 = vadd.f32 %v2166_v11, %v2165_v2  ;;  %v2183_v28 = vadd.f32 %v2182_v60, %v3823_v15  ;;  %v2204_v37 = vadd.f32 %v2203_v3, %v2202_v19 }
 0x1d2   :  { %v2217_v30 = vrot.slane %v2216_v23, 2  ;;  %v2223_v36 = vadd.f32 %v2222_v24, %v2221_v6  ;;  %v2197_v51 = vadd.f32 %v2196_v17, %v2195_v62  ;;  %v2277_v43 = vmax.f32 %v2276_v25, 0.0  ;;  %v2653_v17 = vld [vmem:[%s3874_s4] ss:$0 sm:$0xff] }
 0x1d3   :  { %v2162_v41 = vadd.f32 %v2161_v59, %v2160_v16  ;;  %v2168_v32 = vrot.slane %v2167_v27, 2  ;;  %v2177_v33 = vrot.slane %v3836_v61, 1  ;;  %v2211_v40 = vadd.f32 %v2210_v20, %v2209_v0 }
 0x1d4   :  { %v2218_v57 = vadd.f32 %v2217_v30, %v2216_v23  ;;  %v2224_v44 = vrot.slane %v2223_v36, 2  ;;  %v2191_v34 = vrot.slane %v2190_v26, 1  ;;  %v2184_v63 = vrot.slane %v2183_v28, 1 }
 0x1d5   :  { %v2163_v42 = vrot.slane %v2162_v41, 1  ;;  %v2169_v46 = vadd.f32 %v2168_v32, %v2167_v27  ;;  %v2205_v8 = vrot.slane %v2204_v37, 1  ;;  %v2198_v15 = vrot.slane %v2197_v51, 1 }
 0x1d6   :  { %v2225_v56 = vadd.f32 %v2224_v44, %v2223_v36  ;;  %v2219_v19 = vrot.slane %v2218_v57, 1  ;;  %v2178_v50 = vadd.f32 %v2177_v33, %v3836_v61  ;;  %v2212_v54 = vrot.slane %v2211_v40, 1 }
 0x1d7   :  { %v2164_v60 = vadd.f32 %v2163_v42, %v2162_v41  ;;  %v2170_v62 = vrot.slane %v2169_v46, 1  ;;  %v2278_v10 = vmul.f32 8.0, %v2277_v43  ;;  %v2192_v0 = vadd.f32 %v2191_v34, %v2190_v26 }
 0x1d8   :  { %v2226_v47 = vrot.slane %v2225_v56, 1  ;;  %v2185_v1 = vadd.f32 %v2184_v63, %v2183_v28  ;;  %v2206_v48 = vadd.f32 %v2205_v8, %v2204_v37  ;;  %v2199_v38 = vadd.f32 %v2198_v15, %v2197_v51 }
 0x1d9   :  { %v2249_v29 = vsel %vm2248_vm2, %v2164_v60, %v2247_v18  ;;  %v2171_v31 = vadd.f32 %v2170_v62, %v2169_v46  ;;  %v2220_v5 = vadd.f32 %v2219_v19, %v2218_v57  ;;  %v2213_v61 = vadd.f32 %v2212_v54, %v2211_v40 }
 0x1da   :  { %v2251_v12 = vsel %vm2250_vm3, %v2178_v50, %v2249_v29  ;;  %v2287_v4 = vrot.slane %v2278_v10, %v313_v52  ;;  %v2227_v35 = vadd.f32 %v2226_v47, %v2225_v56  ;;  %v2283_v14 = vrot.slane %v2278_v10, %v309_v49 }
 0x1db   :  { %v2260_v53 = vsel %vm2248_vm2, %v2171_v31, %v2259_v58  ;;  %v2253_v22 = vsel %vm2252_vm4, %v2192_v0, %v2251_v12 }
 0x1dc   :  { %v2255_v13 = vsel %vm2254_vm5, %v2206_v48, %v2253_v22  ;;  %v2261_v55 = vsel %vm2250_vm3, %v2185_v1, %v2260_v53 }
 0x1dd   :  { %v2257_v7 = vsel %vm2256_vm6, %v2220_v5, %v2255_v13  ;;  %v2262_v39 = vsel %vm2252_vm4, %v2199_v38, %v2261_v55 }
 0x1de   :  { %v2263_v2 = vsel %vm2254_vm5, %v2213_v61, %v2262_v39  ;;  %v2290_v9 = vsub.f32 %v2257_v7, %v2283_v14 }
 0x1df   :  { %v2264_v3 = vsel %vm2256_vm6, %v2227_v35, %v2263_v2 }
 0x1e0   :  { %v2291_v21 = vsub.f32 %v2264_v3, %v2287_v4 }
 0x1e2   :  { %2395 = vmatprep.mubr.f32.mxu1 %v2291_v21 }
 0x1e3   :  { %2396 = vmatmul.mubr.f32.vlgmr.msra.gmra.mrb[48].mxu1 %v2290_v9 }
 0x2b6   :  { %v2686_v6 = vpop.f32.mrb[48].mxu1 }
 0x2b7   :  { %v2687_v52 = vpop.f32.mrb[49].mxu1 }
 0x2b8   :  { %v2688_v18 = vadd.f32 %v2687_v52, %v2686_v6 }
 0x2ba   :  { %v2398_v16 = vadd.f32 %v2688_v18, %v2653_v17 }
 0x2bc   :  { %2401 = vst [vmem:[%s3875_s5] sm:$0xff] %v2398_v16 }
 0x2bd   :  { %2406 = vsyncpa [#allocation4], 1 }

</bundles_post_ra>
